<compile_context>
chip_gen: v6e
topology: v6e:2x2x1
jax: 0.10.0
libtpu: 0.0.40
codegen_flags: <defaults>
</compile_context>

<pallas_src>
import numpy as np

import jax
import jax.numpy as jnp
from jax.experimental import pallas as pl
from jax.experimental.pallas import tpu as pltpu

TN12_PREF = 1024   # column tile (flat frame positions) for conv1 / fused conv2
TN3_PREF = 256     # column tile for the fused conv3 stage


def _cdiv(a, b):
    return (a + b - 1) // b


def _round_up(a, b):
    return _cdiv(a, b) * b


def _halo_block(tn):
    # widest 128-multiple halo-block width that divides the tile
    for hb in (512, 256, 128):
        if tn % hb == 0:
            return hb
    return 128


def _pick_tn(total, pref):
    # lane-dense tile (multiple of 128); keep >= 2 grid tiles when possible so
    # the "parallel" grid axis can be sharded across TensorCores.
    cap = max(128, _round_up(_cdiv(total, 2), 128))
    return max(128, min(_round_up(pref, 128), cap))


# ---------------------------------------------------------------------------
# BlockSpec helpers: lane-dense main block + N narrow right-halo blocks that
# deliver the conv-window overhang without inflating the main tile.
# ---------------------------------------------------------------------------
def _win_specs(c, tn, hb, n_halo):
    hpb = tn // hb
    specs = [pl.BlockSpec((c, tn), lambda i: (0, i))]
    for k in range(n_halo):
        specs.append(
            pl.BlockSpec((c, hb), lambda i, _k=k: (0, i * hpb + hpb + _k)))
    return specs


def _full_spec(shape):
    return pl.BlockSpec(tuple(shape), lambda i: (0,) * len(shape))


def _row_spec(tn):
    return pl.BlockSpec((1, tn), lambda i: (0, i))


# ---------------------------------------------------------------------------
# Kernels
# ---------------------------------------------------------------------------
def _make_conv_bn_kernel(offsets, tn, n_win, relu):
    """Conv (stacked-K single matmul) + folded BN (+ ReLU); output masked to
    zero outside valid frame positions (mask row supplied by the wrapper)."""
    def kernel(*refs):
        win = jnp.concatenate([r[...] for r in refs[:n_win]], axis=1)
        w_ref, s_ref, b_ref, m_ref = refs[n_win:n_win + 4]
        o_ref = refs[n_win + 4]
        xa = jnp.concatenate([win[:, o:o + tn] for o in offsets], axis=0)
        y = jnp.dot(w_ref[...], xa, preferred_element_type=jnp.float32)
        y = y * s_ref[...] + b_ref[...]
        if relu:
            y = jnp.maximum(y, 0.0)
        o_ref[...] = (y * m_ref[...]).astype(o_ref.dtype)
    return kernel


def _make_conv2_kernel(offs_a, offs_b, tn, tnz, n_win, n_zwin, res_off):
    """Fused conv2 block: [3x3 + BN + ReLU] -> [3x3 + BN] + residual.
    The conv2a intermediate is recomputed over the halo in VMEM only."""
    def kernel(*refs):
        p = 0
        win = jnp.concatenate([r[...] for r in refs[p:p + n_win]], axis=1)
        p += n_win
        zmw = jnp.concatenate([r[...] for r in refs[p:p + n_zwin]], axis=1)
        p += n_zwin
        wa, sa, ba, wb, sb, bb, om = refs[p:p + 7]
        o_ref = refs[p + 7]
        # conv2a + BN + ReLU, evaluated over the extended range conv2b needs.
        xa = jnp.concatenate([win[:, o:o + tnz] for o in offs_a], axis=0)
        z = jnp.dot(wa[...], xa, preferred_element_type=jnp.float32)
        z = jnp.maximum(z * sa[...] + ba[...], 0.0)
        z = (z * zmw[:, :tnz]).astype(jnp.bfloat16)   # zero outside the image
        # conv2b + BN, residual add, masked into the zero-padded x2 raster.
        zb = jnp.concatenate([z[:, o:o + tn] for o in offs_b], axis=0)
        y = jnp.dot(wb[...], zb, preferred_element_type=jnp.float32)
        y = y * sb[...] + bb[...]
        y = y + win[:, res_off:res_off + tn].astype(jnp.float32)
        o_ref[...] = (y * om[...]).astype(o_ref.dtype)
    return kernel


def _make_conv3_kernel(offsets, tn, n_win):
    """Fused conv3: [3x3 s2 (2x2 taps on s2d input) + BN + ReLU] -> [1x1 + BN]."""
    def kernel(*refs):
        win = jnp.concatenate([r[...] for r in refs[:n_win]], axis=1)
        wa, sa, ba, wb, sb, bb = refs[n_win:n_win + 6]
        o_ref = refs[n_win + 6]
        xa = jnp.concatenate([win[:, o:o + tn] for o in offsets], axis=0)
        y = jnp.dot(wa[...], xa, preferred_element_type=jnp.float32)
        y = jnp.maximum(y * sa[...] + ba[...], 0.0).astype(jnp.bfloat16)
        y = jnp.dot(wb[...], y, preferred_element_type=jnp.float32)
        y = y * sb[...] + bb[...]
        o_ref[...] = y.astype(o_ref.dtype)
    return kernel


def _call(kernel, args, in_specs, out_c, tn, n_tiles, out_dtype=jnp.bfloat16):
    return pl.pallas_call(
        kernel,
        out_shape=jax.ShapeDtypeStruct((out_c, n_tiles * tn), out_dtype),
        grid=(n_tiles,),
        in_specs=in_specs,
        out_specs=pl.BlockSpec((out_c, tn), lambda i: (0, i)),
        compiler_params=pltpu.CompilerParams(
            dimension_semantics=("parallel",)),
    )(*args)


# ---------------------------------------------------------------------------
# Wrapper-side parameter / layout plumbing (all cheap, channel-first)
# ---------------------------------------------------------------------------
def _fold_bn(g, b, m, v, eps=1e-5):
    s = g / jnp.sqrt(v + eps)
    return (s.reshape(-1, 1).astype(jnp.float32),
            (b - m * s).reshape(-1, 1).astype(jnp.float32))


def _stack_taps_3x3(w, pitch):
    # stride-1 3x3 conv: 9 taps stacked along K, flat offsets dh*pitch + dw
    taps = [w[:, :, dh, dw] for dh in range(3) for dw in range(3)]
    offs = [dh * pitch + dw for dh in range(3) for dw in range(3)]
    return jnp.concatenate(taps, axis=1).astype(jnp.bfloat16), offs


def _stack_taps_3x3_s2d(w, pitch):
    # stride-2 3x3 conv re-expressed as a 2x2-tap conv over the
    # space-to-depth input (channel = (2*eta + xi)*Cin + c), taps stacked on K.
    cout, cin = w.shape[:2]
    blocks, offs = [], []
    for da in range(2):
        for db in range(2):
            blk = jnp.zeros((cout, 4 * cin), w.dtype)
            for eta in range(2):
                di = 2 * da + eta
                if di > 2:
                    continue
                for xi in range(2):
                    dj = 2 * db + xi
                    if dj > 2:
                        continue
                    c0 = (2 * eta + xi) * cin
                    blk = blk.at[:, c0:c0 + cin].set(w[:, :, di, dj])
            blocks.append(blk)
            offs.append(da * pitch + db)
    return jnp.concatenate(blocks, axis=1).astype(jnp.bfloat16), offs


def _s2d_cf(x):
    # channel-first space-to-depth: (C, B, Hp, Wp) -> (4C, B, Hp//2, Wp//2)
    C, B, Hp, Wp = x.shape
    xs = x.reshape(C, B, Hp // 2, 2, Wp // 2, 2)
    xs = jnp.transpose(xs, (3, 5, 0, 1, 2, 4))
    return xs.reshape(4 * C, B, Hp // 2, Wp // 2)


def _frame_mask(B, Hf, Wf, r0, r1, c0, c1, front, width):
    # (1, width) 0/1 row marking frame positions (r0:r1, c0:c1) of every image,
    # placed at column offset `front`; built with numpy (trace-time constant).
    fm = np.zeros((Hf, Wf), np.float32)
    fm[r0:r1, c0:c1] = 1.0
    flat = np.tile(fm.reshape(-1), B)
    assert front + flat.size <= width
    row = np.zeros((1, width), np.float32)
    row[0, front:front + flat.size] = flat
    return jnp.asarray(row, dtype=jnp.bfloat16)


# ---------------------------------------------------------------------------
# Stem parameters (deterministic init, PyTorch BatchNorm eval semantics)
# ---------------------------------------------------------------------------
def init_stem_params(key, in_chans=4, embed_dim=32):
    c_half, c_4x = embed_dim // 2, embed_dim * 4

    def conv_w(k, shape):
        return 0.1 * jax.random.normal(k, shape, dtype=jnp.float32)

    def bn(k, c):
        kg, kb = jax.random.split(k)
        return (1.0 + 0.1 * jax.random.normal(kg, (c,), dtype=jnp.float32),
                0.05 * jax.random.normal(kb, (c,), dtype=jnp.float32),
                jnp.zeros((c,), jnp.float32),       # running_mean
                jnp.ones((c,), jnp.float32))        # running_var

    ks = jax.random.split(key, 10)
    p = {}
    p["w1"] = conv_w(ks[0], (c_half, in_chans, 3, 3))
    p["g1"], p["b1"], p["m1"], p["v1"] = bn(ks[1], c_half)
    p["w2a"] = conv_w(ks[2], (c_half, c_half, 3, 3))
    p["g2a"], p["b2a"], p["m2a"], p["v2a"] = bn(ks[3], c_half)
    p["w2b"] = conv_w(ks[4], (c_half, c_half, 3, 3))
    p["g2b"], p["b2b"], p["m2b"], p["v2b"] = bn(ks[5], c_half)
    p["w3a"] = conv_w(ks[6], (c_4x, c_half, 3, 3))
    p["g3a"], p["b3a"], p["m3a"], p["v3a"] = bn(ks[7], c_4x)
    p["w3b"] = conv_w(ks[8], (embed_dim, c_4x, 1, 1))
    p["g3b"], p["b3b"], p["m3b"], p["v3b"] = bn(ks[9], embed_dim)
    return p


# ---------------------------------------------------------------------------
# Forward pass (matches torch Stem.forward, BatchNorm in inference mode)
# ---------------------------------------------------------------------------
def stem_forward(x_nchw, params, patch_size=(4, 4)):
    _, _, H0, W0 = x_nchw.shape
    x = x_nchw
    if W0 % patch_size[1] != 0:
        x = jnp.pad(x, ((0, 0), (0, 0), (0, 0),
                        (0, patch_size[1] - W0 % patch_size[1])))
    if H0 % patch_size[0] != 0:
        x = jnp.pad(x, ((0, 0), (0, 0),
                        (0, patch_size[0] - H0 % patch_size[0]), (0, 0)))
    B, cin, H, W = x.shape
    assert H % 4 == 0 and W % 4 == 0

    ho1, wo1 = H // 2, W // 2
    ho3, wo3 = H // 4, W // 4
    Hf2, Wf2 = ho1 + 2, wo1 + 2                     # conv2-stage frame / pitch
    F2 = Hf2 * Wf2
    Ws3, Fs3 = wo3 + 1, (ho3 + 1) * (wo3 + 1)       # conv3 s2d frame geometry

    c1 = params["w1"].shape[0]                      # embed_dim // 2
    ed = params["w3b"].shape[0]                     # embed_dim

    # ---- tiling ------------------------------------------------------------
    # conv1 writes its output with a left offset P; that offset doubles as the
    # left halo the fused conv2 kernel needs (its taps reach back 2*Wf2+2 cols
    # and its input frames start Wf2+1 columns later than its output frames).
    P = _round_up(3 * Wf2 + 3, 128)
    D = P - 3 * Wf2 - 3                             # residual constant shift

    tn2 = _pick_tn(B * F2, TN12_PREF)
    hb2 = _halo_block(tn2)
    nt2 = _cdiv(B * F2, tn2)
    pad_z = _round_up(2 * Wf2 + 2, 128)             # conv2a extension (lane-dense)
    tnz = tn2 + pad_z
    rh2 = _round_up(D + 2 * Wf2 + 2 + pad_z, hb2)   # right halo (columns)
    nh2 = rh2 // hb2
    nhz = _cdiv(pad_z, hb2)
    w2_read = nt2 * tn2 + rh2

    tn1 = _pick_tn(max(P + B * F2, w2_read), TN12_PREF)
    hb1 = _halo_block(tn1)
    nt1 = _cdiv(max(P + B * F2, w2_read), tn1)
    rh1 = _round_up(Wf2 + 1, hb1)
    nh1 = rh1 // hb1
    w1_out = nt1 * tn1                              # conv1 output == conv2 input
    w1_in = w1_out + rh1

    tn3 = _pick_tn(B * Fs3, TN3_PREF)
    hb3 = _halo_block(tn3)
    nt3 = _cdiv(B * Fs3, tn3)
    rh3 = _round_up(Ws3 + 1, hb3)
    nh3 = rh3 // hb3
    w3_in = nt3 * tn3 + rh3

    # ---- conv1: 3x3 s2 p1 + BN + ReLU (input = space-to-depth frames) ------
    xcf = jnp.transpose(x, (1, 0, 2, 3))                      # (Cin, B, H, W)
    xcf = jnp.pad(xcf, ((0, 0), (0, 0), (1, 1), (1, 1)))      # conv padding=1
    xs1 = _s2d_cf(xcf)                                        # (4Cin,B,ho1+1,wo1+1)
    xs1 = jnp.pad(xs1, ((0, 0), (0, 0), (0, 1), (0, 1)))      # pitch (Hf2, Wf2)
    x1_in = xs1.reshape(4 * cin, B * F2).astype(jnp.bfloat16)
    x1_in = jnp.pad(x1_in, ((0, 0), (P, w1_in - P - B * F2)))

    w1s, off1 = _stack_taps_3x3_s2d(params["w1"], Wf2)
    s1, b1 = _fold_bn(params["g1"], params["b1"], params["m1"], params["v1"])
    mask1 = _frame_mask(B, Hf2, Wf2, 0, ho1, 0, wo1, P, w1_out)

    specs1 = _win_specs(4 * cin, tn1, hb1, nh1) + [
        _full_spec(w1s.shape), _full_spec(s1.shape), _full_spec(b1.shape),
        _row_spec(tn1)]
    y1 = _call(_make_conv_bn_kernel(off1, tn1, 1 + nh1, True),
               [x1_in] * (1 + nh1) + [w1s, s1, b1, mask1],
               specs1, c1, tn1, nt1)
    # y1 (bf16, masked to zero outside valid x1 pixels) is directly the flat
    # input layout consumed by the fused conv2 kernel: no glue pass.

    # ---- conv2 (fused): [3x3 s1 + BN + ReLU] -> [3x3 s1 + BN] + residual ----
    w2a, offb = _stack_taps_3x3(params["w2a"], Wf2)
    w2b, _ = _stack_taps_3x3(params["w2b"], Wf2)
    s2a, b2a = _fold_bn(params["g2a"], params["b2a"],
                        params["m2a"], params["v2a"])
    s2b, b2b = _fold_bn(params["g2b"], params["b2b"],
                        params["m2b"], params["v2b"])
    offa = [D + o for o in offb]
    res_off = D + 2 * Wf2 + 2
    zmask = _frame_mask(B, Hf2, Wf2, 0, ho1, 0, wo1, 2 * Wf2 + 2, w2_read)
    omask = _frame_mask(B, Hf2, Wf2, 1, ho1 + 1, 1, wo1 + 1, 0, nt2 * tn2)

    specs2 = (_win_specs(c1, tn2, hb2, nh2)
              + _win_specs(1, tn2, hb2, nhz)
              + [_full_spec(w2a.shape), _full_spec(s2a.shape),
                 _full_spec(b2a.shape), _full_spec(w2b.shape),
                 _full_spec(s2b.shape), _full_spec(b2b.shape),
                 _row_spec(tn2)])
    args2 = ([y1] * (1 + nh2) + [zmask] * (1 + nhz)
             + [w2a, s2a, b2a, w2b, s2b, b2b, omask])
    y2 = _call(_make_conv2_kernel(offa, offb, tn2, tnz, 1 + nh2, 1 + nhz,
                                  res_off),
               args2, specs2, c1, tn2, nt2)
    # y2[:, :B*F2] is the zero-padded x2 raster (frames of size Hf2 x Wf2).

    # ---- conv3 (fused): [3x3 s2 + BN + ReLU] -> [1x1 + BN] ------------------
    x2p = y2[:, :B * F2].reshape(c1, B, Hf2, Wf2)             # already padded
    xs3 = _s2d_cf(x2p)                                        # (4C1,B,ho3+1,wo3+1)
    x3_in = xs3.reshape(4 * c1, B * Fs3)
    x3_in = jnp.pad(x3_in, ((0, 0), (0, w3_in - B * Fs3)))

    w3a, off3 = _stack_taps_3x3_s2d(params["w3a"], Ws3)
    s3a, b3a = _fold_bn(params["g3a"], params["b3a"],
                        params["m3a"], params["v3a"])
    w3b = params["w3b"][:, :, 0, 0].astype(jnp.bfloat16)
    s3b, b3b = _fold_bn(params["g3b"], params["b3b"],
                        params["m3b"], params["v3b"])

    specs3 = _win_specs(4 * c1, tn3, hb3, nh3) + [
        _full_spec(w3a.shape), _full_spec(s3a.shape), _full_spec(b3a.shape),
        _full_spec(w3b.shape), _full_spec(s3b.shape), _full_spec(b3b.shape)]
    y3 = _call(_make_conv3_kernel(off3, tn3, 1 + nh3),
               [x3_in] * (1 + nh3) + [w3a, s3a, b3a, w3b, s3b, b3b],
               specs3, ed, tn3, nt3)

    # ---- tokens -------------------------------------------------------------
    x3 = y3[:, :B * Fs3].reshape(ed, B, ho3 + 1, wo3 + 1)[:, :, :ho3, :wo3]
    tokens = jnp.transpose(x3, (1, 2, 3, 0)).reshape(B, ho3 * wo3, ed)
    return tokens.astype(jnp.float32), (ho3, wo3)


# ---------------------------------------------------------------------------
# Plain-JAX f32 reference (same module semantics) for a numerical check.
# ---------------------------------------------------------------------------
def reference_stem(x_nchw, params, patch_size=(4, 4), eps=1e-5):
    x = x_nchw
    _, _, H, W = x.shape
    if W % patch_size[1] != 0:
        x = jnp.pad(x, ((0, 0), (0, 0), (0, 0),
                        (0, patch_size[1] - W % patch_size[1])))
    if H % patch_size[0] != 0:
        x = jnp.pad(x, ((0, 0), (0, 0),
                        (0, patch_size[0] - H % patch_size[0]), (0, 0)))

    def cbn(x, w, g, b, m, v, stride, pad, relu):
        y = jax.lax.conv_general_dilated(
            x, w, (stride, stride), [(pad, pad), (pad, pad)],
            dimension_numbers=("NCHW", "OIHW", "NCHW"),
            precision=jax.lax.Precision.HIGHEST)
        s = g / jnp.sqrt(v + eps)
        y = y * s.reshape(1, -1, 1, 1) + (b - m * s).reshape(1, -1, 1, 1)
        return jnp.maximum(y, 0.0) if relu else y

    x1 = cbn(x, params["w1"], params["g1"], params["b1"],
             params["m1"], params["v1"], 2, 1, True)
    y = cbn(x1, params["w2a"], params["g2a"], params["b2a"],
            params["m2a"], params["v2a"], 1, 1, True)
    x2 = cbn(y, params["w2b"], params["g2b"], params["b2b"],
             params["m2b"], params["v2b"], 1, 1, False) + x1
    z = cbn(x2, params["w3a"], params["g3a"], params["b3a"],
            params["m3a"], params["v3a"], 2, 1, True)
    x3 = cbn(z, params["w3b"], params["g3b"], params["b3b"],
             params["m3b"], params["v3b"], 1, 0, False)
    B, C, Ho, Wo = x3.shape
    tokens = jnp.transpose(x3.reshape(B, C, Ho * Wo), (0, 2, 1))
    return tokens, (Ho, Wo)


if __name__ == "__main__":
    key = jax.random.PRNGKey(0)
    k_in, k_par = jax.random.split(key)

    B, in_chans, H, W = 2, 4, 16, 16
    embed_dim = 32
    x = jax.random.normal(k_in, (B, in_chans, H, W), dtype=jnp.float32)
    params = init_stem_params(k_par, in_chans=in_chans, embed_dim=embed_dim)

    tokens, out_size = jax.jit(stem_forward)(x, params)
    tokens = jax.block_until_ready(tokens)
    out_size = (int(out_size[0]), int(out_size[1]))

    assert tokens.shape == (B, (H // 4) * (W // 4), embed_dim), tokens.shape
    assert out_size == (H // 4, W // 4), out_size
    assert bool(jnp.all(jnp.isfinite(tokens)))

    # Numerical check against the plain-JAX f32 reference of the same module
    # (kernel path runs conv operands in bf16, so allow a small tolerance).
    tokens_ref, _ = reference_stem(x, params)
    err = float(jnp.max(jnp.abs(tokens - tokens_ref)))
    ref = float(jnp.max(jnp.abs(tokens_ref)))
    assert err <= 0.05 * ref + 0.03, ("mismatch vs reference", err, ref)

    print("KERNEL_OK")
</pallas_src>

<mosaic_0001>
module attributes {stable_mosaic.version = 11 : i64} {
  func.func @kernel(%arg0: i32, %arg1: memref<16x256xbf16, #tpu.memory_space<vmem>>, %arg2: memref<16x256xbf16, #tpu.memory_space<vmem>>, %arg3: memref<16x64xbf16, #tpu.memory_space<vmem>>, %arg4: memref<16x1xf32, #tpu.memory_space<vmem>>, %arg5: memref<16x1xf32, #tpu.memory_space<vmem>>, %arg6: memref<1x256xbf16, #tpu.memory_space<vmem>>, %arg7: memref<16x256xbf16, #tpu.memory_space<vmem>>) attributes {dimension_semantics = [#tpu.dimension_semantics<parallel>], iteration_bounds = array<i64: 2>, scalar_prefetch = 0 : i64, scratch_operands = 0 : i64, tpu.core_type = #tpu.core_type<tc>, window_params = [{transform_indices = @transform_0, window_bounds = array<i64: 16, 256>}, {transform_indices = @transform_1, window_bounds = array<i64: 16, 256>}, {pipeline_mode = #tpu.pipeline_mode<synchronous>, transform_indices = @transform_2, window_bounds = array<i64: 16, 64>}, {pipeline_mode = #tpu.pipeline_mode<synchronous>, transform_indices = @transform_3, window_bounds = array<i64: 16, 1>}, {pipeline_mode = #tpu.pipeline_mode<synchronous>, transform_indices = @transform_4, window_bounds = array<i64: 16, 1>}, {transform_indices = @transform_5, window_bounds = array<i64: 1, 256>}, {transform_indices = @transform_6, window_bounds = array<i64: 16, 256>}]} {
    %c0 = arith.constant 0 : index
    %c0_0 = arith.constant 0 : index
    %0 = vector.load %arg1[%c0, %c0_0] : memref<16x256xbf16, #tpu.memory_space<vmem>>, vector<16x256xbf16>
    %c0_1 = arith.constant 0 : index
    %c0_2 = arith.constant 0 : index
    %1 = vector.load %arg2[%c0_1, %c0_2] : memref<16x256xbf16, #tpu.memory_space<vmem>>, vector<16x256xbf16>
    %2 = tpu.concatenate %0, %1 in 1 : vector<16x256xbf16>, vector<16x256xbf16> -> vector<16x512xbf16>
    %3 = vector.extract_strided_slice %2 {offsets = [0, 0], sizes = [16, 256], strides = [1, 1]} : vector<16x512xbf16> to vector<16x256xbf16>
    %4 = vector.extract_strided_slice %2 {offsets = [0, 1], sizes = [16, 256], strides = [1, 1]} : vector<16x512xbf16> to vector<16x256xbf16>
    %5 = vector.extract_strided_slice %2 {offsets = [0, 10], sizes = [16, 256], strides = [1, 1]} : vector<16x512xbf16> to vector<16x256xbf16>
    %6 = vector.extract_strided_slice %2 {offsets = [0, 11], sizes = [16, 256], strides = [1, 1]} : vector<16x512xbf16> to vector<16x256xbf16>
    %7 = tpu.concatenate %3, %4, %5, %6 in 0 : vector<16x256xbf16>, vector<16x256xbf16>, vector<16x256xbf16>, vector<16x256xbf16> -> vector<64x256xbf16>
    %c0_3 = arith.constant 0 : index
    %c0_4 = arith.constant 0 : index
    %8 = vector.load %arg3[%c0_3, %c0_4] : memref<16x64xbf16, #tpu.memory_space<vmem>>, vector<16x64xbf16>
    %cst = arith.constant dense<0.000000e+00> : vector<16x256xf32>
    %9 = tpu.matmul %8, %7, %cst {dimension_numbers = #tpu.dot_dimension_numbers<[1], [0], [0], [1], [0, 0, 1, 1], [], []>} : vector<16x64xbf16>, vector<64x256xbf16>, vector<16x256xf32> -> vector<16x256xf32>
    %c0_5 = arith.constant 0 : index
    %c0_6 = arith.constant 0 : index
    %10 = vector.load %arg4[%c0_5, %c0_6] : memref<16x1xf32, #tpu.memory_space<vmem>>, vector<16x1xf32>
    %11 = vector.broadcast %10 : vector<16x1xf32> to vector<16x256xf32>
    %12 = arith.mulf %9, %11 : vector<16x256xf32>
    %c0_7 = arith.constant 0 : index
    %c0_8 = arith.constant 0 : index
    %13 = vector.load %arg5[%c0_7, %c0_8] : memref<16x1xf32, #tpu.memory_space<vmem>>, vector<16x1xf32>
    %14 = vector.broadcast %13 : vector<16x1xf32> to vector<16x256xf32>
    %15 = arith.addf %12, %14 : vector<16x256xf32>
    %cst_9 = arith.constant 0.000000e+00 : f32
    %16 = vector.broadcast %cst_9 : f32 to vector<16x256xf32>
    %17 = arith.maximumf %15, %16 : vector<16x256xf32>
    %c0_10 = arith.constant 0 : index
    %c0_11 = arith.constant 0 : index
    %18 = vector.load %arg6[%c0_10, %c0_11] : memref<1x256xbf16, #tpu.memory_space<vmem>>, vector<1x256xbf16>
    %19 = arith.extf %18 : vector<1x256xbf16> to vector<1x256xf32>
    %20 = vector.broadcast %19 : vector<1x256xf32> to vector<16x256xf32>
    %21 = arith.mulf %17, %20 : vector<16x256xf32>
    %22 = arith.truncf %21 : vector<16x256xf32> to vector<16x256xbf16>
    %c0_12 = arith.constant 0 : index
    %c0_13 = arith.constant 0 : index
    %23 = vector.load %arg7[%c0_12, %c0_13] : memref<16x256xbf16, #tpu.memory_space<vmem>>, vector<16x256xbf16>
    tpu.vector_store %arg7[%c0_12, %c0_13], %22 {strides = array<i32>} : memref<16x256xbf16, #tpu.memory_space<vmem>>, vector<16x256xbf16>,
    return
  }
  func.func @transform_0(%arg0: i32) -> (i32, i32) {
    %c0_i32 = arith.constant 0 : i32
    %c0_i32_0 = arith.constant 0 : i32
    return %c0_i32, %arg0 : i32, i32
  }
  func.func @transform_1(%arg0: i32) -> (i32, i32) {
    %c1_i32 = arith.constant 1 : i32
    %0 = arith.muli %arg0, %c1_i32 : i32
    %c1_i32_0 = arith.constant 1 : i32
    %1 = arith.addi %0, %c1_i32_0 : i32
    %c0_i32 = arith.constant 0 : i32
    %2 = arith.addi %1, %c0_i32 : i32
    %c0_i32_1 = arith.constant 0 : i32
    %c0_i32_2 = arith.constant 0 : i32
    return %c0_i32_1, %2 : i32, i32
  }
  func.func @transform_2(%arg0: i32) -> (i32, i32) {
    %c0_i32 = arith.constant 0 : i32
    %c0_i32_0 = arith.constant 0 : i32
    %c0_i32_1 = arith.constant 0 : i32
    return %c0_i32, %c0_i32_0 : i32, i32
  }
  func.func @transform_3(%arg0: i32) -> (i32, i32) {
    %c0_i32 = arith.constant 0 : i32
    %c0_i32_0 = arith.constant 0 : i32
    %c0_i32_1 = arith.constant 0 : i32
    return %c0_i32, %c0_i32_0 : i32, i32
  }
  func.func @transform_4(%arg0: i32) -> (i32, i32) {
    %c0_i32 = arith.constant 0 : i32
    %c0_i32_0 = arith.constant 0 : i32
    %c0_i32_1 = arith.constant 0 : i32
    return %c0_i32, %c0_i32_0 : i32, i32
  }
  func.func @transform_5(%arg0: i32) -> (i32, i32) {
    %c0_i32 = arith.constant 0 : i32
    %c0_i32_0 = arith.constant 0 : i32
    return %c0_i32, %arg0 : i32, i32
  }
  func.func @transform_6(%arg0: i32) -> (i32, i32) {
    %c0_i32 = arith.constant 0 : i32
    %c0_i32_0 = arith.constant 0 : i32
    return %c0_i32, %arg0 : i32, i32
  }
}

module attributes {stable_mosaic.version = 11 : i64} {
  func.func @kernel(%arg0: i32, %arg1: memref<16x128xbf16, #tpu.memory_space<vmem>>, %arg2: memref<16x128xbf16, #tpu.memory_space<vmem>>, %arg3: memref<16x128xbf16, #tpu.memory_space<vmem>>, %arg4: memref<1x128xbf16, #tpu.memory_space<vmem>>, %arg5: memref<1x128xbf16, #tpu.memory_space<vmem>>, %arg6: memref<16x144xbf16, #tpu.memory_space<vmem>>, %arg7: memref<16x1xf32, #tpu.memory_space<vmem>>, %arg8: memref<16x1xf32, #tpu.memory_space<vmem>>, %arg9: memref<16x144xbf16, #tpu.memory_space<vmem>>, %arg10: memref<16x1xf32, #tpu.memory_space<vmem>>, %arg11: memref<16x1xf32, #tpu.memory_space<vmem>>, %arg12: memref<1x128xbf16, #tpu.memory_space<vmem>>, %arg13: memref<16x128xbf16, #tpu.memory_space<vmem>>) attributes {dimension_semantics = [#tpu.dimension_semantics<parallel>], iteration_bounds = array<i64: 2>, scalar_prefetch = 0 : i64, scratch_operands = 0 : i64, tpu.core_type = #tpu.core_type<tc>, window_params = [{transform_indices = @transform_0, window_bounds = array<i64: 16, 128>}, {transform_indices = @transform_1, window_bounds = array<i64: 16, 128>}, {transform_indices = @transform_2, window_bounds = array<i64: 16, 128>}, {transform_indices = @transform_3, window_bounds = array<i64: 1, 128>}, {transform_indices = @transform_4, window_bounds = array<i64: 1, 128>}, {pipeline_mode = #tpu.pipeline_mode<synchronous>, transform_indices = @transform_5, window_bounds = array<i64: 16, 144>}, {pipeline_mode = #tpu.pipeline_mode<synchronous>, transform_indices = @transform_6, window_bounds = array<i64: 16, 1>}, {pipeline_mode = #tpu.pipeline_mode<synchronous>, transform_indices = @transform_7, window_bounds = array<i64: 16, 1>}, {pipeline_mode = #tpu.pipeline_mode<synchronous>, transform_indices = @transform_8, window_bounds = array<i64: 16, 144>}, {pipeline_mode = #tpu.pipeline_mode<synchronous>, transform_indices = @transform_9, window_bounds = array<i64: 16, 1>}, {pipeline_mode = #tpu.pipeline_mode<synchronous>, transform_indices = @transform_10, window_bounds = array<i64: 16, 1>}, {transform_indices = @transform_11, window_bounds = array<i64: 1, 128>}, {transform_indices = @transform_12, window_bounds = array<i64: 16, 128>}]} {
    %c0 = arith.constant 0 : index
    %c0_0 = arith.constant 0 : index
    %0 = vector.load %arg1[%c0, %c0_0] : memref<16x128xbf16, #tpu.memory_space<vmem>>, vector<16x128xbf16>
    %c0_1 = arith.constant 0 : index
    %c0_2 = arith.constant 0 : index
    %1 = vector.load %arg2[%c0_1, %c0_2] : memref<16x128xbf16, #tpu.memory_space<vmem>>, vector<16x128xbf16>
    %c0_3 = arith.constant 0 : index
    %c0_4 = arith.constant 0 : index
    %2 = vector.load %arg3[%c0_3, %c0_4] : memref<16x128xbf16, #tpu.memory_space<vmem>>, vector<16x128xbf16>
    %3 = tpu.concatenate %0, %1, %2 in 1 : vector<16x128xbf16>, vector<16x128xbf16>, vector<16x128xbf16> -> vector<16x384xbf16>
    %c0_5 = arith.constant 0 : index
    %c0_6 = arith.constant 0 : index
    %4 = vector.load %arg4[%c0_5, %c0_6] : memref<1x128xbf16, #tpu.memory_space<vmem>>, vector<1x128xbf16>
    %c0_7 = arith.constant 0 : index
    %c0_8 = arith.constant 0 : index
    %5 = vector.load %arg5[%c0_7, %c0_8] : memref<1x128xbf16, #tpu.memory_space<vmem>>, vector<1x128xbf16>
    %6 = tpu.concatenate %4, %5 in 1 : vector<1x128xbf16>, vector<1x128xbf16> -> vector<1x256xbf16>
    %7 = vector.extract_strided_slice %3 {offsets = [0, 95], sizes = [16, 256], strides = [1, 1]} : vector<16x384xbf16> to vector<16x256xbf16>
    %8 = vector.extract_strided_slice %3 {offsets = [0, 96], sizes = [16, 256], strides = [1, 1]} : vector<16x384xbf16> to vector<16x256xbf16>
    %9 = vector.extract_strided_slice %3 {offsets = [0, 97], sizes = [16, 256], strides = [1, 1]} : vector<16x384xbf16> to vector<16x256xbf16>
    %10 = vector.extract_strided_slice %3 {offsets = [0, 105], sizes = [16, 256], strides = [1, 1]} : vector<16x384xbf16> to vector<16x256xbf16>
    %11 = vector.extract_strided_slice %3 {offsets = [0, 106], sizes = [16, 256], strides = [1, 1]} : vector<16x384xbf16> to vector<16x256xbf16>
    %12 = vector.extract_strided_slice %3 {offsets = [0, 107], sizes = [16, 256], strides = [1, 1]} : vector<16x384xbf16> to vector<16x256xbf16>
    %13 = vector.extract_strided_slice %3 {offsets = [0, 115], sizes = [16, 256], strides = [1, 1]} : vector<16x384xbf16> to vector<16x256xbf16>
    %14 = vector.extract_strided_slice %3 {offsets = [0, 116], sizes = [16, 256], strides = [1, 1]} : vector<16x384xbf16> to vector<16x256xbf16>
    %15 = vector.extract_strided_slice %3 {offsets = [0, 117], sizes = [16, 256], strides = [1, 1]} : vector<16x384xbf16> to vector<16x256xbf16>
    %16 = tpu.concatenate %7, %8, %9, %10, %11, %12, %13, %14, %15 in 0 : vector<16x256xbf16>, vector<16x256xbf16>, vector<16x256xbf16>, vector<16x256xbf16>, vector<16x256xbf16>, vector<16x256xbf16>, vector<16x256xbf16>, vector<16x256xbf16>, vector<16x256xbf16> -> vector<144x256xbf16>
    %c0_9 = arith.constant 0 : index
    %c0_10 = arith.constant 0 : index
    %17 = vector.load %arg6[%c0_9, %c0_10] : memref<16x144xbf16, #tpu.memory_space<vmem>>, vector<16x144xbf16>
    %cst = arith.constant dense<0.000000e+00> : vector<16x256xf32>
    %18 = tpu.matmul %17, %16, %cst {dimension_numbers = #tpu.dot_dimension_numbers<[1], [0], [0], [1], [0, 0, 1, 1], [], []>} : vector<16x144xbf16>, vector<144x256xbf16>, vector<16x256xf32> -> vector<16x256xf32>
    %c0_11 = arith.constant 0 : index
    %c0_12 = arith.constant 0 : index
    %19 = vector.load %arg7[%c0_11, %c0_12] : memref<16x1xf32, #tpu.memory_space<vmem>>, vector<16x1xf32>
    %20 = vector.broadcast %19 : vector<16x1xf32> to vector<16x256xf32>
    %21 = arith.mulf %18, %20 : vector<16x256xf32>
    %c0_13 = arith.constant 0 : index
    %c0_14 = arith.constant 0 : index
    %22 = vector.load %arg8[%c0_13, %c0_14] : memref<16x1xf32, #tpu.memory_space<vmem>>, vector<16x1xf32>
    %23 = vector.broadcast %22 : vector<16x1xf32> to vector<16x256xf32>
    %24 = arith.addf %21, %23 : vector<16x256xf32>
    %cst_15 = arith.constant 0.000000e+00 : f32
    %25 = vector.broadcast %cst_15 : f32 to vector<16x256xf32>
    %26 = arith.maximumf %24, %25 : vector<16x256xf32>
    %27 = arith.extf %6 : vector<1x256xbf16> to vector<1x256xf32>
    %28 = vector.broadcast %27 : vector<1x256xf32> to vector<16x256xf32>
    %29 = arith.mulf %26, %28 : vector<16x256xf32>
    %30 = arith.truncf %29 : vector<16x256xf32> to vector<16x256xbf16>
    %31 = vector.extract_strided_slice %30 {offsets = [0, 0], sizes = [16, 128], strides = [1, 1]} : vector<16x256xbf16> to vector<16x128xbf16>
    %32 = vector.extract_strided_slice %30 {offsets = [0, 1], sizes = [16, 128], strides = [1, 1]} : vector<16x256xbf16> to vector<16x128xbf16>
    %33 = vector.extract_strided_slice %30 {offsets = [0, 2], sizes = [16, 128], strides = [1, 1]} : vector<16x256xbf16> to vector<16x128xbf16>
    %34 = vector.extract_strided_slice %30 {offsets = [0, 10], sizes = [16, 128], strides = [1, 1]} : vector<16x256xbf16> to vector<16x128xbf16>
    %35 = vector.extract_strided_slice %30 {offsets = [0, 11], sizes = [16, 128], strides = [1, 1]} : vector<16x256xbf16> to vector<16x128xbf16>
    %36 = vector.extract_strided_slice %30 {offsets = [0, 12], sizes = [16, 128], strides = [1, 1]} : vector<16x256xbf16> to vector<16x128xbf16>
    %37 = vector.extract_strided_slice %30 {offsets = [0, 20], sizes = [16, 128], strides = [1, 1]} : vector<16x256xbf16> to vector<16x128xbf16>
    %38 = vector.extract_strided_slice %30 {offsets = [0, 21], sizes = [16, 128], strides = [1, 1]} : vector<16x256xbf16> to vector<16x128xbf16>
    %39 = vector.extract_strided_slice %30 {offsets = [0, 22], sizes = [16, 128], strides = [1, 1]} : vector<16x256xbf16> to vector<16x128xbf16>
    %40 = tpu.concatenate %31, %32, %33, %34, %35, %36, %37, %38, %39 in 0 : vector<16x128xbf16>, vector<16x128xbf16>, vector<16x128xbf16>, vector<16x128xbf16>, vector<16x128xbf16>, vector<16x128xbf16>, vector<16x128xbf16>, vector<16x128xbf16>, vector<16x128xbf16> -> vector<144x128xbf16>
    %c0_16 = arith.constant 0 : index
    %c0_17 = arith.constant 0 : index
    %41 = vector.load %arg9[%c0_16, %c0_17] : memref<16x144xbf16, #tpu.memory_space<vmem>>, vector<16x144xbf16>
    %cst_18 = arith.constant dense<0.000000e+00> : vector<16x128xf32>
    %42 = tpu.matmul %41, %40, %cst_18 {dimension_numbers = #tpu.dot_dimension_numbers<[1], [0], [0], [1], [0, 0, 1, 1], [], []>} : vector<16x144xbf16>, vector<144x128xbf16>, vector<16x128xf32> -> vector<16x128xf32>
    %c0_19 = arith.constant 0 : index
    %c0_20 = arith.constant 0 : index
    %43 = vector.load %arg10[%c0_19, %c0_20] : memref<16x1xf32, #tpu.memory_space<vmem>>, vector<16x1xf32>
    %44 = vector.broadcast %43 : vector<16x1xf32> to vector<16x128xf32>
    %45 = arith.mulf %42, %44 : vector<16x128xf32>
    %c0_21 = arith.constant 0 : index
    %c0_22 = arith.constant 0 : index
    %46 = vector.load %arg11[%c0_21, %c0_22] : memref<16x1xf32, #tpu.memory_space<vmem>>, vector<16x1xf32>
    %47 = vector.broadcast %46 : vector<16x1xf32> to vector<16x128xf32>
    %48 = arith.addf %45, %47 : vector<16x128xf32>
    %49 = vector.extract_strided_slice %3 {offsets = [0, 117], sizes = [16, 128], strides = [1, 1]} : vector<16x384xbf16> to vector<16x128xbf16>
    %50 = arith.extf %49 : vector<16x128xbf16> to vector<16x128xf32>
    %51 = arith.addf %48, %50 : vector<16x128xf32>
    %c0_23 = arith.constant 0 : index
    %c0_24 = arith.constant 0 : index
    %52 = vector.load %arg12[%c0_23, %c0_24] : memref<1x128xbf16, #tpu.memory_space<vmem>>, vector<1x128xbf16>
    %53 = arith.extf %52 : vector<1x128xbf16> to vector<1x128xf32>
    %54 = vector.broadcast %53 : vector<1x128xf32> to vector<16x128xf32>
    %55 = arith.mulf %51, %54 : vector<16x128xf32>
    %56 = arith.truncf %55 : vector<16x128xf32> to vector<16x128xbf16>
    %c0_25 = arith.constant 0 : index
    %c0_26 = arith.constant 0 : index
    %57 = vector.load %arg13[%c0_25, %c0_26] : memref<16x128xbf16, #tpu.memory_space<vmem>>, vector<16x128xbf16>
    tpu.vector_store %arg13[%c0_25, %c0_26], %56 {strides = array<i32>} : memref<16x128xbf16, #tpu.memory_space<vmem>>, vector<16x128xbf16>,
    return
  }
  func.func @transform_0(%arg0: i32) -> (i32, i32) {
    %c0_i32 = arith.constant 0 : i32
    %c0_i32_0 = arith.constant 0 : i32
    return %c0_i32, %arg0 : i32, i32
  }
  func.func @transform_1(%arg0: i32) -> (i32, i32) {
    %c1_i32 = arith.constant 1 : i32
    %0 = arith.muli %arg0, %c1_i32 : i32
    %c1_i32_0 = arith.constant 1 : i32
    %1 = arith.addi %0, %c1_i32_0 : i32
    %c0_i32 = arith.constant 0 : i32
    %2 = arith.addi %1, %c0_i32 : i32
    %c0_i32_1 = arith.constant 0 : i32
    %c0_i32_2 = arith.constant 0 : i32
    return %c0_i32_1, %2 : i32, i32
  }
  func.func @transform_2(%arg0: i32) -> (i32, i32) {
    %c1_i32 = arith.constant 1 : i32
    %0 = arith.muli %arg0, %c1_i32 : i32
    %c1_i32_0 = arith.constant 1 : i32
    %1 = arith.addi %0, %c1_i32_0 : i32
    %c1_i32_1 = arith.constant 1 : i32
    %2 = arith.addi %1, %c1_i32_1 : i32
    %c0_i32 = arith.constant 0 : i32
    %c0_i32_2 = arith.constant 0 : i32
    return %c0_i32, %2 : i32, i32
  }
  func.func @transform_3(%arg0: i32) -> (i32, i32) {
    %c0_i32 = arith.constant 0 : i32
    %c0_i32_0 = arith.constant 0 : i32
    return %c0_i32, %arg0 : i32, i32
  }
  func.func @transform_4(%arg0: i32) -> (i32, i32) {
    %c1_i32 = arith.constant 1 : i32
    %0 = arith.muli %arg0, %c1_i32 : i32
    %c1_i32_0 = arith.constant 1 : i32
    %1 = arith.addi %0, %c1_i32_0 : i32
    %c0_i32 = arith.constant 0 : i32
    %2 = arith.addi %1, %c0_i32 : i32
    %c0_i32_1 = arith.constant 0 : i32
    %c0_i32_2 = arith.constant 0 : i32
    return %c0_i32_1, %2 : i32, i32
  }
  func.func @transform_5(%arg0: i32) -> (i32, i32) {
    %c0_i32 = arith.constant 0 : i32
    %c0_i32_0 = arith.constant 0 : i32
    %c0_i32_1 = arith.constant 0 : i32
    return %c0_i32, %c0_i32_0 : i32, i32
  }
  func.func @transform_6(%arg0: i32) -> (i32, i32) {
    %c0_i32 = arith.constant 0 : i32
    %c0_i32_0 = arith.constant 0 : i32
    %c0_i32_1 = arith.constant 0 : i32
    return %c0_i32, %c0_i32_0 : i32, i32
  }
  func.func @transform_7(%arg0: i32) -> (i32, i32) {
    %c0_i32 = arith.constant 0 : i32
    %c0_i32_0 = arith.constant 0 : i32
    %c0_i32_1 = arith.constant 0 : i32
    return %c0_i32, %c0_i32_0 : i32, i32
  }
  func.func @transform_8(%arg0: i32) -> (i32, i32) {
    %c0_i32 = arith.constant 0 : i32
    %c0_i32_0 = arith.constant 0 : i32
    %c0_i32_1 = arith.constant 0 : i32
    return %c0_i32, %c0_i32_0 : i32, i32
  }
  func.func @transform_9(%arg0: i32) -> (i32, i32) {
    %c0_i32 = arith.constant 0 : i32
    %c0_i32_0 = arith.constant 0 : i32
    %c0_i32_1 = arith.constant 0 : i32
    return %c0_i32, %c0_i32_0 : i32, i32
  }
  func.func @transform_10(%arg0: i32) -> (i32, i32) {
    %c0_i32 = arith.constant 0 : i32
    %c0_i32_0 = arith.constant 0 : i32
    %c0_i32_1 = arith.constant 0 : i32
    return %c0_i32, %c0_i32_0 : i32, i32
  }
  func.func @transform_11(%arg0: i32) -> (i32, i32) {
    %c0_i32 = arith.constant 0 : i32
    %c0_i32_0 = arith.constant 0 : i32
    return %c0_i32, %arg0 : i32, i32
  }
  func.func @transform_12(%arg0: i32) -> (i32, i32) {
    %c0_i32 = arith.constant 0 : i32
    %c0_i32_0 = arith.constant 0 : i32
    return %c0_i32, %arg0 : i32, i32
  }
}

module attributes {stable_mosaic.version = 11 : i64} {
  func.func @kernel(%arg0: i32, %arg1: memref<64x128xbf16, #tpu.memory_space<vmem>>, %arg2: memref<64x128xbf16, #tpu.memory_space<vmem>>, %arg3: memref<128x256xbf16, #tpu.memory_space<vmem>>, %arg4: memref<128x1xf32, #tpu.memory_space<vmem>>, %arg5: memref<128x1xf32, #tpu.memory_space<vmem>>, %arg6: memref<32x128xbf16, #tpu.memory_space<vmem>>, %arg7: memref<32x1xf32, #tpu.memory_space<vmem>>, %arg8: memref<32x1xf32, #tpu.memory_space<vmem>>, %arg9: memref<32x128xbf16, #tpu.memory_space<vmem>>) attributes {dimension_semantics = [#tpu.dimension_semantics<parallel>], iteration_bounds = array<i64: 1>, scalar_prefetch = 0 : i64, scratch_operands = 0 : i64, tpu.core_type = #tpu.core_type<tc>, window_params = [{transform_indices = @transform_0, window_bounds = array<i64: 64, 128>}, {transform_indices = @transform_1, window_bounds = array<i64: 64, 128>}, {pipeline_mode = #tpu.pipeline_mode<synchronous>, transform_indices = @transform_2, window_bounds = array<i64: 128, 256>}, {pipeline_mode = #tpu.pipeline_mode<synchronous>, transform_indices = @transform_3, window_bounds = array<i64: 128, 1>}, {pipeline_mode = #tpu.pipeline_mode<synchronous>, transform_indices = @transform_4, window_bounds = array<i64: 128, 1>}, {pipeline_mode = #tpu.pipeline_mode<synchronous>, transform_indices = @transform_5, window_bounds = array<i64: 32, 128>}, {pipeline_mode = #tpu.pipeline_mode<synchronous>, transform_indices = @transform_6, window_bounds = array<i64: 32, 1>}, {pipeline_mode = #tpu.pipeline_mode<synchronous>, transform_indices = @transform_7, window_bounds = array<i64: 32, 1>}, {transform_indices = @transform_8, window_bounds = array<i64: 32, 128>}]} {
    %c0 = arith.constant 0 : index
    %c0_0 = arith.constant 0 : index
    %0 = vector.load %arg1[%c0, %c0_0] : memref<64x128xbf16, #tpu.memory_space<vmem>>, vector<64x128xbf16>
    %c0_1 = arith.constant 0 : index
    %c0_2 = arith.constant 0 : index
    %1 = vector.load %arg2[%c0_1, %c0_2] : memref<64x128xbf16, #tpu.memory_space<vmem>>, vector<64x128xbf16>
    %2 = tpu.concatenate %0, %1 in 1 : vector<64x128xbf16>, vector<64x128xbf16> -> vector<64x256xbf16>
    %3 = vector.extract_strided_slice %2 {offsets = [0, 0], sizes = [64, 128], strides = [1, 1]} : vector<64x256xbf16> to vector<64x128xbf16>
    %4 = vector.extract_strided_slice %2 {offsets = [0, 1], sizes = [64, 128], strides = [1, 1]} : vector<64x256xbf16> to vector<64x128xbf16>
    %5 = vector.extract_strided_slice %2 {offsets = [0, 5], sizes = [64, 128], strides = [1, 1]} : vector<64x256xbf16> to vector<64x128xbf16>
    %6 = vector.extract_strided_slice %2 {offsets = [0, 6], sizes = [64, 128], strides = [1, 1]} : vector<64x256xbf16> to vector<64x128xbf16>
    %7 = tpu.concatenate %3, %4, %5, %6 in 0 : vector<64x128xbf16>, vector<64x128xbf16>, vector<64x128xbf16>, vector<64x128xbf16> -> vector<256x128xbf16>
    %c0_3 = arith.constant 0 : index
    %c0_4 = arith.constant 0 : index
    %8 = vector.load %arg3[%c0_3, %c0_4] : memref<128x256xbf16, #tpu.memory_space<vmem>>, vector<128x256xbf16>
    %cst = arith.constant dense<0.000000e+00> : vector<128x128xf32>
    %9 = tpu.matmul %8, %7, %cst {dimension_numbers = #tpu.dot_dimension_numbers<[1], [0], [0], [1], [0, 0, 1, 1], [], []>} : vector<128x256xbf16>, vector<256x128xbf16>, vector<128x128xf32> -> vector<128x128xf32>
    %c0_5 = arith.constant 0 : index
    %c0_6 = arith.constant 0 : index
    %10 = vector.load %arg4[%c0_5, %c0_6] : memref<128x1xf32, #tpu.memory_space<vmem>>, vector<128x1xf32>
    %11 = vector.broadcast %10 : vector<128x1xf32> to vector<128x128xf32>
    %12 = arith.mulf %9, %11 : vector<128x128xf32>
    %c0_7 = arith.constant 0 : index
    %c0_8 = arith.constant 0 : index
    %13 = vector.load %arg5[%c0_7, %c0_8] : memref<128x1xf32, #tpu.memory_space<vmem>>, vector<128x1xf32>
    %14 = vector.broadcast %13 : vector<128x1xf32> to vector<128x128xf32>
    %15 = arith.addf %12, %14 : vector<128x128xf32>
    %cst_9 = arith.constant 0.000000e+00 : f32
    %16 = vector.broadcast %cst_9 : f32 to vector<128x128xf32>
    %17 = arith.maximumf %15, %16 : vector<128x128xf32>
    %18 = arith.truncf %17 : vector<128x128xf32> to vector<128x128xbf16>
    %c0_10 = arith.constant 0 : index
    %c0_11 = arith.constant 0 : index
    %19 = vector.load %arg6[%c0_10, %c0_11] : memref<32x128xbf16, #tpu.memory_space<vmem>>, vector<32x128xbf16>
    %cst_12 = arith.constant dense<0.000000e+00> : vector<32x128xf32>
    %20 = tpu.matmul %19, %18, %cst_12 {dimension_numbers = #tpu.dot_dimension_numbers<[1], [0], [0], [1], [0, 0, 1, 1], [], []>} : vector<32x128xbf16>, vector<128x128xbf16>, vector<32x128xf32> -> vector<32x128xf32>
    %c0_13 = arith.constant 0 : index
    %c0_14 = arith.constant 0 : index
    %21 = vector.load %arg7[%c0_13, %c0_14] : memref<32x1xf32, #tpu.memory_space<vmem>>, vector<32x1xf32>
    %22 = vector.broadcast %21 : vector<32x1xf32> to vector<32x128xf32>
    %23 = arith.mulf %20, %22 : vector<32x128xf32>
    %c0_15 = arith.constant 0 : index
    %c0_16 = arith.constant 0 : index
    %24 = vector.load %arg8[%c0_15, %c0_16] : memref<32x1xf32, #tpu.memory_space<vmem>>, vector<32x1xf32>
    %25 = vector.broadcast %24 : vector<32x1xf32> to vector<32x128xf32>
    %26 = arith.addf %23, %25 : vector<32x128xf32>
    %27 = arith.truncf %26 : vector<32x128xf32> to vector<32x128xbf16>
    %c0_17 = arith.constant 0 : index
    %c0_18 = arith.constant 0 : index
    %28 = vector.load %arg9[%c0_17, %c0_18] : memref<32x128xbf16, #tpu.memory_space<vmem>>, vector<32x128xbf16>
    tpu.vector_store %arg9[%c0_17, %c0_18], %27 {strides = array<i32>} : memref<32x128xbf16, #tpu.memory_space<vmem>>, vector<32x128xbf16>,
    return
  }
  func.func @transform_0(%arg0: i32) -> (i32, i32) {
    %c0_i32 = arith.constant 0 : i32
    %c0_i32_0 = arith.constant 0 : i32
    return %c0_i32, %arg0 : i32, i32
  }
  func.func @transform_1(%arg0: i32) -> (i32, i32) {
    %c1_i32 = arith.constant 1 : i32
    %0 = arith.muli %arg0, %c1_i32 : i32
    %c1_i32_0 = arith.constant 1 : i32
    %1 = arith.addi %0, %c1_i32_0 : i32
    %c0_i32 = arith.constant 0 : i32
    %2 = arith.addi %1, %c0_i32 : i32
    %c0_i32_1 = arith.constant 0 : i32
    %c0_i32_2 = arith.constant 0 : i32
    return %c0_i32_1, %2 : i32, i32
  }
  func.func @transform_2(%arg0: i32) -> (i32, i32) {
    %c0_i32 = arith.constant 0 : i32
    %c0_i32_0 = arith.constant 0 : i32
    %c0_i32_1 = arith.constant 0 : i32
    return %c0_i32, %c0_i32_0 : i32, i32
  }
  func.func @transform_3(%arg0: i32) -> (i32, i32) {
    %c0_i32 = arith.constant 0 : i32
    %c0_i32_0 = arith.constant 0 : i32
    %c0_i32_1 = arith.constant 0 : i32
    return %c0_i32, %c0_i32_0 : i32, i32
  }
  func.func @transform_4(%arg0: i32) -> (i32, i32) {
    %c0_i32 = arith.constant 0 : i32
    %c0_i32_0 = arith.constant 0 : i32
    %c0_i32_1 = arith.constant 0 : i32
    return %c0_i32, %c0_i32_0 : i32, i32
  }
  func.func @transform_5(%arg0: i32) -> (i32, i32) {
    %c0_i32 = arith.constant 0 : i32
    %c0_i32_0 = arith.constant 0 : i32
    %c0_i32_1 = arith.constant 0 : i32
    return %c0_i32, %c0_i32_0 : i32, i32
  }
  func.func @transform_6(%arg0: i32) -> (i32, i32) {
    %c0_i32 = arith.constant 0 : i32
    %c0_i32_0 = arith.constant 0 : i32
    %c0_i32_1 = arith.constant 0 : i32
    return %c0_i32, %c0_i32_0 : i32, i32
  }
  func.func @transform_7(%arg0: i32) -> (i32, i32) {
    %c0_i32 = arith.constant 0 : i32
    %c0_i32_0 = arith.constant 0 : i32
    %c0_i32_1 = arith.constant 0 : i32
    return %c0_i32, %c0_i32_0 : i32, i32
  }
  func.func @transform_8(%arg0: i32) -> (i32, i32) {
    %c0_i32 = arith.constant 0 : i32
    %c0_i32_0 = arith.constant 0 : i32
    return %c0_i32, %arg0 : i32, i32
  }
}

</mosaic_0001>

<bundles_post_ra>
// kernel: stem_forward.3
= control target key start
LH: loop header
LB: loop body
LE: loop exit
PB: predicated region body
PF: predicated region fallthrough
CT: control target
= control target key end

     0   :  { %s847_s21 = smov 0   ;;  %s849_s22 = smov 0   ;;  %s966_s0 = inlined_call_operand.vmem [shape: bf16[16,768], index: 0, kind: input, shape index: {}, may-alias: {0,1}]   ;;  %s967_s1 = inlined_call_operand.vmem [shape: bf16[16,768], index: 1, kind: input, shape index: {}, may-alias: {0,1}]   ;;  %s968_s2 = inlined_call_operand.vmem [shape: bf16[16,64], index: 2, kind: input, shape index: {}]   ;;  %s969_s3 = inlined_call_operand.vmem [shape: f32[16,1], index: 3, kind: input, shape index: {}]   ;;  %s970_s4 = inlined_call_operand.vmem [shape: f32[16,1], index: 4, kind: input, shape index: {}]   ;;  %s971_s5 = inlined_call_operand.vmem [shape: bf16[1,512], index: 5, kind: input, shape index: {}]   ;;  %s972_s6 = inlined_call_operand.vmem [shape: bf16[16,512], index: 6, kind: output, shape index: {}]  }
   0x1   :  { %s851_s23 = smov 0   ;;  %s853_s24 = smov 0  }
   0x2   :  { %s855_s25 = smov 0  }
   0x3 LB: > { %s873_s26 = sadd.s32 4294967295, %s806_s25   ;;  %s876_s27 = sadd.s32 1, %s806_s25   ;;  %s806_s25 = sphi %s855_s25, %s979_s25   ;;  %s802_s24 = sphi %s853_s24, %s978_s24   ;;  %s798_s23 = sphi %s851_s23, %s977_s23   ;;  %s794_s22 = sphi %s849_s22, %s976_s22   ;;  %s790_s21 = sphi %s847_s21, %s975_s21  }
   0x4   : > { %s20_s28 = ssub.s32 %s806_s25, %s876_s27  ;;  %s23_s29 = sadd.s32 1, %s802_s24 }
   0x5   : > { %p21_p0 = scmp.eq.s32.totalorder %s20_s28, 0  ;;  %p30_p1 = scmp.ne.s32.totalorder %s802_s24, %s798_s23 }
   0x6   : > { %p31_p2 = scmp.eq.s32.totalorder %s806_s25, 0  ;;  %s47_s30 = sadd.s32 1, %s876_s27 }
   0x7   : > { %s886_s7 = scalar_select %p21_p0, %s802_s24, %s23_s29  }
   0x8   : > { %p32_p3 = por %p31_p2, %p30_p1  ;;  %s48_s8 = ssub.s32 %s876_s27, %s47_s30 }
   0x9   : > { %p49_p4 = scmp.eq.s32.totalorder %s48_s8, 0  ;;  %s51_s9 = sadd.s32 1, %s794_s22 }
   0xa   : > { %p58_p5 = scmp.ne.s32.totalorder %s794_s22, %s790_s21  ;;  %p177_p6 = scmp.eq.s32.totalorder %s873_s26, 1 }
   0xb   : > { %s894_s10 = scalar_select %p49_p4, %s794_s22, %s51_s9  }
   0xc   : > { %p896_p7 = por %p58_p5, %p31_p2  ;;  %p900_p8 = por %p177_p6, %p30_p1 }
   0xd   : > { %p688_p9 = scmp.ge.s32.totalorder %s806_s25, 2 }
   0xf   : > { %208 = sbr.rel (%p688_p9) target bundleno = 30 (0x1e), region = 28 }
  0x14   : > { %211 = sbr.rel (!%p32_p3) target bundleno = 25 (0x19), region = 32  ;;  %s213_s13 = sand.u32 (%p32_p3), 1, %s802_s24  }
  0x15   : > { %s713_s14 = sshll.u32 (%p32_p3), %s806_s25, 3  ;;  %s689_s15 = sshll.u32 (%p32_p3), %s213_s13, 4 }
  0x16   : > { %s218_s18 = scalar_lea.vmem (%p32_p3), %s966_s0, %s713_s14  ;;  %s215_s19 = scalar_lea.vmem (%p32_p3), [#allocation2], %s689_s15 }
  0x17   : > { %v249_v0 = vld [vmem:[%s218_s18] sm:$0xff] (%p32_p3)  ;;  %v251_v1 = vld [vmem:[%s218_s18 + $0x18] sm:$0xff] (%p32_p3) }
  0x18   : > { %250 = vst [vmem:[%s215_s19] sm:$0xff] (%p32_p3), %v249_v0  ;;  %252 = vst [vmem:[%s215_s19 + $0x8] sm:$0xff] (%p32_p3), %v251_v1 }
  0x19 PF: > { %258 = sbr.rel (!%p896_p7) target bundleno = 30 (0x1e), region = 70  ;;  %s260_s20 = sand.u32 (%p896_p7), 1, %s794_s22  }
  0x1a   : > { %s693_s28 = sshll.u32 (%p896_p7), %s806_s25, 3  ;;  %s692_s29 = sshll.u32 (%p896_p7), %s260_s20, 4 }
  0x1b   : > { %s620_s9 = scalar_lea.vmem (%p896_p7), %s967_s1, %s693_s28  ;;  %s262_s13 = scalar_lea.vmem (%p896_p7), [#allocation3], %s692_s29 }
  0x1c   : > { %v694_v2 = vld [vmem:[%s620_s9 + $0x8] sm:$0xff] (%p896_p7)  ;;  %v695_v3 = vld [vmem:[%s620_s9 + $0x20] sm:$0xff] (%p896_p7) }
  0x1d   : > { %298 = vst [vmem:[%s262_s13] sm:$0xff] (%p896_p7), %v694_v2  ;;  %300 = vst [vmem:[%s262_s13 + $0x8] sm:$0xff] (%p896_p7), %v695_v3 }
  0x1e PF: > { %p696_p10 = scmp.ge.s32.totalorder %s806_s25, 1  ;;  %p313_p11 = scmp.lt.s32.totalorder %s806_s25, 3 }
  0x20   : > { %p314_p12 = pnand %p696_p10, %p313_p11 }
  0x21   : > { %s320_s11 = sand.u32 (!%p314_p12), 1, %s798_s23   ;;  %s327_s15 = sand.u32 (!%p314_p12), 1, %s790_s21  }
  0x22   : > { %317 = sbr.rel (%p314_p12) target bundleno = 397 (0x18d), region = 112  ;;  %s920_s14 = sshll.u32 (!%p314_p12), %s320_s11, 4 }
  0x23   : > { %s698_s16 = sshll.u32 (!%p314_p12), %s327_s15, 4  ;;  %s322_s17 = scalar_lea.vmem (!%p314_p12), [#allocation2], %s920_s14 }
  0x24   : > { %s329_s18 = scalar_lea.vmem (!%p314_p12), [#allocation3], %s698_s16  ;;  %s808_s19 = smov (!%p314_p12), 117  }
  0x25   : > { %s809_s25 = smov (!%p314_p12), 118   ;;  %s811_s23 = smov (!%p314_p12), 127  }
  0x26   : > { %s700_s16 = sshll.u32 (!%p314_p12), %s873_s26, 1 }
  0x27   : > { %v763_v4 = vld [vmem:[%s322_s17 + $0x4] ss:$8 sps:$4 sm:$0xff]   ;;  %v765_v5 = vld [vmem:[%s322_s17] ss:$8 sps:$4 sm:$0xff]   ;;  %v810_v7 = vmov 0   ;;  %vm420_vm0 = vcmask 957440   ;;  %v518_v28 = vlaneseq }
  0x28   : > { %416 = vrot.lane.b32.xlu0 %v763_v4, %s808_s19  ;;  %v766_v6 = vld [vmem:[%s329_s18] ss:$8 sps:$4 sm:$0xff]   ;;  %414 = vrot.lane.b32.xlu1 %v765_v5, %s808_s19  ;;  %vm409_vm1 = vcmask 965632   ;;  %vm398_vm2 = vcmask 1039360   ;;  %vm432_vm3 = vcmask 523264   ;;  %p367_p13 = scmp.lt.s32.totalorder %s700_s16, 3 }
  0x29   : > { %468 = vmatprep.mubr.bf16.mxu0 %v810_v7  ;;  %761 = vset.pattern.permute.xlu1 %v810_v7  ;;  %v479_v8 = vld [vmem:[%s969_s3] sm:$0xff]  ;;  %v480_v9 = vld [vmem:[%s969_s3 + $0x8] sm:$0xff]  ;;  %v519_v29 = vshrl.u32 %v518_v28, 7 }
  0x2a   : > { %762 = vset.pattern.permute.xlu0 %v810_v7  ;;  %v495_v10 = vld [vmem:[%s970_s4] sm:$0xff]  ;;  %v496_v11 = vld [vmem:[%s970_s4 + $0x8] sm:$0xff]  ;;  %s981_s16 = smov (!%p367_p13, %s700_s16), 3 }
  0x2b   : > { %v767_v27 = vld [vmem:[%s968_s2] sm:$0xff]   ;;  %v520_v33 = vsub.s32 0, %v519_v29  ;;  %v524_v34 = vsub.s32 2, %v519_v29 }
  0x2c   : > { %418 = vrot.lane.b32.xlu0 %v766_v6, %s808_s19  ;;  %405 = vrot.lane.b32.xlu1 %v763_v4, %s809_s25  ;;  %s369_s19 = scalar_lea.vmem %s971_s5, %s981_s16 }
  0x2d   : > { %v515_v30 = vld [vmem:[%s369_s19] sm:$0x3] }
  0x2e   : > { %v516_v32 = vunpack.c.l.bf16 %v515_v30 }
  0x30   : > { %407 = vrot.lane.b32.xlu0 %v766_v6, %s809_s25  ;;  %403 = vrot.lane.b32.xlu1 %v765_v5, %s809_s25  ;;  %v521_v37 = vrot.slane %v516_v32, %v520_v33  ;;  %v525_v39 = vrot.slane %v516_v32, %v524_v34  ;;  %s362_s25 = scalar_lea.vmem [#allocation4], %s920_s14 }
  0x32   : > { %v531_v44 = vrot.slane %v521_v37, %v520_v33  ;;  %v535_v48 = vrot.slane %v525_v39, %v520_v33 }
  0x34   : > { %394 = vrot.lane.b32.xlu0 %v763_v4, %s811_s23  ;;  %396 = vrot.lane.b32.xlu1 %v766_v6, %s811_s23 }
  0x38   : > { %392 = vrot.lane.b32.xlu0 %v765_v5, %s811_s23  ;;  %483 = vperm.xlu1 %761, %v479_v8   ;;  %s716_s23 = sshll.u32 (%p900_p8), %s873_s26, 3 }
  0x39   : > { %s563_s28 = scalar_lea.vmem (%p900_p8), %s972_s6, %s716_s23 }
  0x3c   : > { %488 = vperm.xlu0 %762, %v480_v9   ;;  %499 = vperm.xlu1 %761, %v495_v10  }
  0x40   : > { %504 = vperm.xlu1 %761, %v496_v11  }
  0x9a   : > { %v417_v12 = vpop.permute.xlu0 %416  ;;  %v415_v13 = vpop.permute.xlu1 %414 }
  0x9b   : > { %v421_v17 = vsel %vm420_vm0, %v415_v13, %v417_v12 }
  0x9e   : > { %v419_v14 = vpop.permute.xlu0 %418  ;;  %v406_v15 = vpop.permute.xlu1 %405 }
  0x9f   : > { %v422_v16 = vsel %vm420_vm0, %v417_v12, %v419_v14 }
  0xa0   : > { %444 = vmatprep.subr.bf16.mxu0 %v422_v16 }
  0xa1   : > { %445 = vmatpush1.bf16.msra.mxu0 %v421_v17 }
  0xa2   : > { %v408_v18 = vpop.permute.xlu0 %407  ;;  %v404_v19 = vpop.permute.xlu1 %403 }
  0xa3   : > { %v411_v20 = vsel %vm409_vm1, %v406_v15, %v408_v18  ;;  %v410_v21 = vsel %vm409_vm1, %v404_v19, %v406_v15 }
  0xa4   : > { %446 = vmatprep.subr.bf16.mxu0 %v411_v20 }
  0xa5   : > { %447 = vmatpush1.bf16.msra.mxu0 %v410_v21 }
  0xa6   : > { %v395_v22 = vpop.permute.xlu0 %394  ;;  %v397_v23 = vpop.permute.xlu1 %396 }
  0xa7   : > { %v400_v24 = vsel %vm398_vm2, %v395_v22, %v397_v23 }
  0xa8   : > { %448 = vmatprep.subr.bf16.mxu0 %v400_v24 }
  0xaa   : > { %v393_v25 = vpop.permute.xlu0 %392 }
  0xab   : > { %v399_v26 = vsel %vm398_vm2, %v393_v25, %v395_v22 }
  0xac   : > { %449 = vmatpush1.bf16.msra.mxu0 %v399_v26 }
  0xad   : > { %450 = vmatprep.subr.bf16.mxu0 %v763_v4 }
  0xb0   : > { %451 = vmatpush1.bf16.msra.mxu0 %v765_v5 }
  0xb3   : > { %705 = vmatmul.mubr.msk.bf16.vlgmr.msra.gmra.mxu0 %vm432_vm3, %v767_v27  ;;  %v484_v31 = vpop.permute.xlu1 %483 }
  0xb7   : > { %v500_v35 = vpop.permute.xlu1 %499  ;;  %v489_v41 = vpop.permute.xlu0 %488 }
  0xbb   : > { %v505_v50 = vpop.permute.xlu1 %504 }
 0x173   : > { %v470_v36 = vpop.f32.mrf.mxu0 }
 0x174   : > { %v491_v38 = vmul.f32 %v484_v31, %v470_v36 }
 0x175   : > { %v472_v40 = vpop.f32.mrf.mxu0 }
 0x176   : > { %v507_v42 = vadd.f32 %v500_v35, %v491_v38  ;;  %v492_v43 = vmul.f32 %v484_v31, %v472_v40 }
 0x177   : > { %v474_v45 = vpop.f32.mrf.mxu0 }
 0x178   : > { %v511_v46 = vmax.f32 %v507_v42, 0.0  ;;  %v508_v47 = vadd.f32 %v500_v35, %v492_v43  ;;  %v493_v49 = vmul.f32 %v489_v41, %v474_v45 }
 0x179   : > { %v476_v51 = vpop.f32.mrf.mxu0 }
 0x17a   : > { %v512_v52 = vmax.f32 %v508_v47, 0.0  ;;  %v509_v53 = vadd.f32 %v505_v50, %v493_v49  ;;  %v494_v54 = vmul.f32 %v489_v41, %v476_v51  ;;  %v536_v55 = vmul.f32 %v531_v44, %v511_v46 }
 0x17c   : > { %v537_v56 = vmul.f32 %v535_v48, %v512_v52  ;;  %v513_v57 = vmax.f32 %v509_v53, 0.0  ;;  %v510_v58 = vadd.f32 %v505_v50, %v494_v54 }
 0x17e   : > { %v714_v59 = vpack.c.bf16 %v537_v56, %v536_v55  ;;  %v514_v60 = vmax.f32 %v510_v58, 0.0  ;;  %v538_v61 = vmul.f32 %v531_v44, %v513_v57 }
 0x180   : > { %552 = vst [vmem:[%s362_s25] sm:$0xff] %v714_v59  ;;  %v539_v62 = vmul.f32 %v535_v48, %v514_v60  ;;  %560 = sbr.rel (!%p900_p8) target bundleno = 397 (0x18d), region = 124 }
 0x182   : > { %v715_v63 = vpack.c.bf16 %v539_v62, %v538_v61 }
 0x184   : > { %553 = vst [vmem:[%s362_s25 + $0x8] sm:$0xff] %v715_v63 }
 0x187   : > { %v594_v0 = vld [vmem:[%s362_s25] sm:$0xff] }
 0x188   : > { %595 = vst [vmem:[%s563_s28] sm:$0xff] %v594_v0 }
 0x18b   : > { %v596_v1 = vld [vmem:[%s362_s25 + $0x8] sm:$0xff] }
 0x18c   : > { %597 = vst [vmem:[%s563_s28 + $0x10] sm:$0xff] %v596_v1 }
 0x18d PF: > { %p13_p0 = scmp.ge.s32.totalorder %s876_s27, 4   ;;  %s975_s21 = smov %s794_s22 }
 0x18e   : > { %s976_s22 = smov %s894_s10  ;;  %s977_s23 = smov %s802_s24 }
 0x18f   : > { %s978_s24 = smov %s886_s7  ;;  %s979_s25 = smov %s876_s27 }
 0x190   :  { %15 = sbr.rel (!%p13_p0) target bundleno = 3 (0x3), region = 204 }

// kernel: stem_forward.4
= control target key start
LH: loop header
LB: loop body
LE: loop exit
PB: predicated region body
PF: predicated region fallthrough
CT: control target
= control target key end

     0   :  { %s1934_s0 = inlined_call_operand.vmem [shape: bf16[16,512], index: 0, kind: input, shape index: {}, may-alias: {0,1,2}]   ;;  %s1935_s1 = inlined_call_operand.vmem [shape: bf16[16,512], index: 1, kind: input, shape index: {}, may-alias: {0,1,2}]   ;;  %s1936_s2 = inlined_call_operand.vmem [shape: bf16[16,512], index: 2, kind: input, shape index: {}, may-alias: {0,1,2}]   ;;  %s1937_s3 = inlined_call_operand.vmem [shape: bf16[1,512], index: 3, kind: input, shape index: {}, may-alias: {3,4}]   ;;  %s1938_s4 = inlined_call_operand.vmem [shape: bf16[1,512], index: 4, kind: input, shape index: {}, may-alias: {3,4}]   ;;  %s1939_s5 = inlined_call_operand.vmem [shape: bf16[16,144], index: 5, kind: input, shape index: {}]   ;;  %s1940_s6 = inlined_call_operand.vmem [shape: f32[16,1], index: 6, kind: input, shape index: {}]   ;;  %s1941_s7 = inlined_call_operand.vmem [shape: f32[16,1], index: 7, kind: input, shape index: {}]   ;;  %s1942_s8 = inlined_call_operand.vmem [shape: bf16[16,144], index: 8, kind: input, shape index: {}]   ;;  %s1943_s9 = inlined_call_operand.vmem [shape: f32[16,1], index: 9, kind: input, shape index: {}]   ;;  %s1944_s10 = inlined_call_operand.vmem [shape: f32[16,1], index: 10, kind: input, shape index: {}]   ;;  %s1945_s11 = inlined_call_operand.vmem [shape: bf16[1,256], index: 11, kind: input, shape index: {}]   ;;  %s1946_s12 = inlined_call_operand.vmem [shape: bf16[16,256], index: 12, kind: output, shape index: {}]  }
   0x1   :  { %1954 = sst [smem:[#allocation12_spill]] %s1944_s10 }
   0x2   :  { %1955 = sst [smem:[#allocation13_spill]] %s1945_s11 }
   0x3   :  { %1956 = sst [smem:[#allocation14_spill]] %s1946_s12 }
   0x4   :  { %s1555_s21 = smov 0   ;;  %s1557_s22 = smov 0  }
   0x5   :  { %s1559_s23 = smov 0   ;;  %s1561_s24 = smov 0  }
   0x6   :  { %s1563_s25 = smov 0   ;;  %s1565_s26 = smov 0  }
   0x7   :  { %s1567_s27 = smov 0  }
   0x8 LB: > { %1957 = sst [smem:[#allocation6_spill]] %s1473_s26  ;;  %s1591_s28 = sadd.s32 4294967295, %s1477_s27   ;;  %s1477_s27 = sphi %s1567_s27, %s1972_s27   ;;  %s1473_s26 = sphi %s1565_s26, %s1976_s26   ;;  %s1469_s25 = sphi %s1563_s25, %s1975_s25   ;;  %s1465_s24 = sphi %s1561_s24, %s1980_s24   ;;  %s1461_s23 = sphi %s1559_s23, %s1979_s23   ;;  %s1457_s22 = sphi %s1557_s22, %s1978_s22   ;;  %s1453_s21 = sphi %s1555_s21, %s1977_s21  }
   0x9   : > { %s1594_s29 = sadd.s32 1, %s1477_s27   ;;  %s29_s13 = sadd.s32 1, %s1473_s26 }
   0xa   : > { %1958 = sst [smem:[#allocation7_spill]] %s1594_s29  ;;  %s26_s30 = ssub.s32 %s1477_s27, %s1594_s29 }
   0xb   : > { %p27_p0 = scmp.eq.s32.totalorder %s26_s30, 0  ;;  %p36_p1 = scmp.ne.s32.totalorder %s1473_s26, %s1469_s25 }
   0xc   : > { %p37_p2 = scmp.eq.s32.totalorder %s1477_s27, 0  ;;  %s53_s14 = sadd.s32 1, %s1594_s29 }
   0xd   : > { %s1604_s15 = scalar_select %p27_p0, %s1473_s26, %s29_s13  }
   0xe   : > { %p1611_p3 = por %p37_p2, %p36_p1  ;;  %s54_s17 = ssub.s32 %s1594_s29, %s53_s14 }
   0xf   : > { %1959 = sst [smem:[#allocation8_spill]] %s1604_s15  ;;  %p55_p4 = scmp.eq.s32.totalorder %s54_s17, 0 }
  0x10   : > { %s57_s18 = sadd.s32 1, %s1465_s24  ;;  %p64_p5 = scmp.ne.s32.totalorder %s1465_s24, %s1461_s23 }
  0x11   : > { %s80_s19 = sadd.s32 2, %s1477_s27  ;;  %s81_s13 = sadd.s32 2, %s1594_s29 }
  0x12   : > { %s1621_s20 = scalar_select %p55_p4, %s1465_s24, %s57_s18  }
  0x13   : > { %p1625_p6 = por %p64_p5, %p37_p2  ;;  %s82_s15 = ssub.s32 %s80_s19, %s81_s13 }
  0x14   : > { %1961 = sst [smem:[#allocation9_spill]] %s1621_s20  ;;  %s85_s12 = sadd.s32 1, %s1457_s22 }
  0x15   : > { %p83_p7 = scmp.eq.s32.totalorder %s82_s15, 0  ;;  %p92_p8 = scmp.ne.s32.totalorder %s1457_s22, %s1453_s21 }
  0x16   : > { %p328_p9 = scmp.eq.s32.totalorder %s1591_s28, 1  ;;  %p1297_p12 = scmp.ge.s32.totalorder %s1477_s27, 2 }
  0x17   : > { %s1635_s11 = scalar_select %p83_p7, %s1457_s22, %s85_s12  }
  0x18   : > { %p1639_p10 = por %p92_p8, %p37_p2  ;;  %p1646_p11 = por %p328_p9, %p36_p1 }
  0x19   : > { %1963 = sst [smem:[#allocation10_spill]] %s1635_s11  ;;  %368 = sbr.rel (%p1297_p12) target bundleno = 45 (0x2d), region = 40 }
  0x1a   : > { %s1965_s17 = scalar_select %p1646_p11, 1, 0 }
  0x1c   : > { %1966 = sst [smem:[#allocation11_spill]] %s1965_s17 }
  0x1e   : > { %371 = sbr.rel (!%p1611_p3) target bundleno = 35 (0x23), region = 44  ;;  %s373_s12 = sand.u32 (%p1611_p3), 1, %s1473_s26  }
  0x1f   : > { %s1299_s15 = sshll.u32 (%p1611_p3), %s1477_s27, 2  ;;  %s1298_s18 = sshll.u32 (%p1611_p3), %s373_s12, 3 }
  0x20   : > { %s377_s20 = scalar_lea.vmem (%p1611_p3), %s1934_s0, %s1299_s15  ;;  %s375_s11 = scalar_lea.vmem (%p1611_p3), [#allocation2], %s1298_s18 }
  0x21   : > { %v394_v0 = vld [vmem:[%s377_s20] sm:$0xf] (%p1611_p3)  ;;  %v396_v1 = vld [vmem:[%s377_s20 + $0x10] sm:$0xf] (%p1611_p3) }
  0x22   : > { %395 = vst [vmem:[%s375_s11] sm:$0xf] (%p1611_p3), %v394_v0  ;;  %397 = vst [vmem:[%s375_s11 + $0x4] sm:$0xf] (%p1611_p3), %v396_v1 }
  0x23 PF: > { %425 = sbr.rel (!%p1625_p6) target bundleno = 40 (0x28), region = 85  ;;  %s427_s16 = sand.u32 (%p1625_p6), 1, %s1465_s24  }
  0x24   : > { %s1301_s29 = sshll.u32 (%p1625_p6), %s1477_s27, 2  ;;  %s1300_s26 = sshll.u32 (%p1625_p6), %s427_s16, 3 }
  0x25   : > { %s1192_s10 = scalar_lea.vmem (%p1625_p6), %s1935_s1, %s1301_s29  ;;  %s429_s15 = scalar_lea.vmem (%p1625_p6), [#allocation3], %s1300_s26 }
  0x26   : > { %v1302_v2 = vld [vmem:[%s1192_s10 + $0x4] sm:$0xf] (%p1625_p6)  ;;  %v1303_v3 = vld [vmem:[%s1192_s10 + $0x14] sm:$0xf] (%p1625_p6) }
  0x27   : > { %450 = vst [vmem:[%s429_s15] sm:$0xf] (%p1625_p6), %v1302_v2  ;;  %452 = vst [vmem:[%s429_s15 + $0x4] sm:$0xf] (%p1625_p6), %v1303_v3 }
  0x28 PF: > { %480 = sbr.rel (!%p1639_p10) target bundleno = 45 (0x2d), region = 126  ;;  %s482_s11 = sand.u32 (%p1639_p10), 1, %s1457_s22  }
  0x29   : > { %s1305_s20 = sshll.u32 (%p1639_p10), %s1477_s27, 2  ;;  %s1304_s30 = sshll.u32 (%p1639_p10), %s482_s11, 3 }
  0x2a   : > { %s1197_s13 = scalar_lea.vmem (%p1639_p10), %s1936_s2, %s1305_s20  ;;  %s484_s29 = scalar_lea.vmem (%p1639_p10), [#allocation4], %s1304_s30 }
  0x2b   : > { %v1306_v4 = vld [vmem:[%s1197_s13 + $0x8] sm:$0xf] (%p1639_p10)  ;;  %v1307_v5 = vld [vmem:[%s1197_s13 + $0x18] sm:$0xf] (%p1639_p10) }
  0x2c   : > { %505 = vst [vmem:[%s484_s29] sm:$0xf] (%p1639_p10), %v1306_v4  ;;  %507 = vst [vmem:[%s484_s29 + $0x4] sm:$0xf] (%p1639_p10), %v1307_v5 }
  0x2d PF: > { %p1308_p13 = scmp.ge.s32.totalorder %s1477_s27, 1  ;;  %p554_p0 = scmp.lt.s32.totalorder %s1477_s27, 3 }
  0x2f   : > { %p555_p1 = pnand %p1308_p13, %p554_p0 }
  0x30   : > { %s568_s10 = sand.u32 (!%p555_p1), 1, %s1461_s23   ;;  %s561_s14 = sand.u32 (!%p555_p1), 1, %s1469_s25  }
  0x31   : > { %558 = sbr.rel (%p555_p1) target bundleno = 941 (0x3ad), region = 179  ;;  %s1310_s26 = sshll.u32 (!%p555_p1), %s568_s10, 3 }
  0x32   : > { %s1676_s17 = sshll.u32 (!%p555_p1), %s561_s14, 3  ;;  %s570_s16 = scalar_lea.vmem (!%p555_p1), [#allocation3], %s1310_s26 }
  0x33   : > { %s563_s12 = scalar_lea.vmem (!%p555_p1), [#allocation2], %s1676_s17  ;;  %s575_s15 = sand.u32 (!%p555_p1), 1, %s1453_s21  }
  0x34   : > { %s1479_s11 = smov (!%p555_p1), 107   ;;  %s1311_s27 = sshll.u32 (!%p555_p1), %s575_s15, 3 }
  0x35   : > { %s577_s23 = scalar_lea.vmem (!%p555_p1), [#allocation4], %s1311_s27  ;;  %s1480_s25 = smov (!%p555_p1), 108  }
  0x36   : > { %v1678_v6 = vld [vmem:[%s570_s16] sm:$0xff]   ;;  %v1681_v7 = vld [vmem:[%s563_s12] sm:$0xff]   ;;  %s1481_s21 = smov 116   ;;  %s1482_s20 = smov 117   ;;  %vm732_vm0 = vcmask 875520   ;;  %vm723_vm1 = vcmask 883712  }
  0x37   : > { %728 = vrot.lane.b32.xlu0 %v1678_v6, %s1479_s11  ;;  %726 = vrot.lane.b32.xlu1 %v1681_v7, %s1479_s11  ;;  %v1688_v8 = vld [vmem:[%s577_s23] sm:$0xff]   ;;  %s1483_s30 = smov 118   ;;  %s1484_s18 = smov 126   ;;  %vm714_vm2 = vcmask 949248   ;;  %vm705_vm3 = vcmask 957440   ;;  %vm696_vm4 = vcmask 965632  }
  0x38   : > { %s1485_s19 = smov 127   ;;  %s1952_s13 = smov 106   ;;  %vm687_vm5 = vcmask 1031168   ;;  %vm678_vm6 = vcmask 1039360   ;;  %v1419_v43 = vld [vmem:[%s1939_s5 + $0x4] ss:$8 sps:$4 sm:$0xff]  }
  0x39   : > { %s1487_s29 = smov 33   ;;  %vm846_vm7 = vcmask 130048   ;;  %vm741_vm8 = vcmask 867328   ;;  %v1488_v47 = vmov 0   ;;  %v893_v50 = vld [vmem:[%s1940_s6] sm:$0xff]  ;;  %v894_v52 = vld [vmem:[%s1940_s6 + $0x8] sm:$0xff] }
  0x3a   : > { %1318 = vmatprep.mubr.msk.bf16.mxu0 %vm846_vm7, %v1419_v43  ;;  %1402 = vset.pattern.permute.xlu1 %v1488_v47  ;;  %v909_v53 = vld [vmem:[%s1941_s7] sm:$0xff]  ;;  %v910_v54 = vld [vmem:[%s1941_s7 + $0x8] sm:$0xff]  ;;  %vm809_vm9 = vcmask 269312   ;;  %s638_s16 = sadd.s32 1, %s1591_s28  ;;  %p635_p2 = scmp.lt.s32.totalorder %s1591_s28, 3  ;;  %vm1094_vm10 = vcmask 89088  }
  0x3b   : > { %730 = vrot.lane.b32.xlu0 %v1688_v8, %s1479_s11  ;;  %719 = vrot.lane.b32.xlu1 %v1678_v6, %s1480_s25  ;;  %p639_p3 = scmp.lt.s32.totalorder %s638_s16, 3  ;;  %s1489_s15 = smov 11  }
  0x3c   : > { %1403 = vset.pattern.permute.xlu0 %v1488_v47  ;;  %1009 = vmatprep.subr.bf16.mxu1 %v1488_v47  ;;  %s636_s12 = scalar_select %p635_p2, %s1591_s28, 3 }
  0x3d   : > { %s1982_s16 = smov (!%p639_p3, %s638_s16), 3  ;;  %p643_p4 = scmp.lt.s32.totalorder %s1591_s28, 1 }
  0x3e   : > { %s637_s23 = scalar_lea.vmem %s1937_s3, %s636_s12  ;;  %s1971_s14 = sld [smem:[#allocation14_spill]] (%p1646_p11) }
  0x3f   : > { %721 = vrot.lane.b32.xlu0 %v1688_v8, %s1480_s25  ;;  %717 = vrot.lane.b32.xlu1 %v1681_v7, %s1480_s25  ;;  %v670_v43 = vld [vmem:[%s637_s23] sm:$0x1]  ;;  %s644_s10 = scalar_select %p643_p4, %s1591_s28, 1 }
  0x43   : > { %710 = vrot.lane.b32.xlu0 %v1678_v6, %s1481_s21  ;;  %712 = vrot.lane.b32.xlu1 %v1688_v8, %s1481_s21 }
  0x47   : > { %708 = vrot.lane.b32.xlu0 %v1681_v7, %s1481_s21  ;;  %701 = vrot.lane.b32.xlu1 %v1678_v6, %s1482_s20 }
  0x4b   : > { %703 = vrot.lane.b32.xlu0 %v1688_v8, %s1482_s20  ;;  %699 = vrot.lane.b32.xlu1 %v1681_v7, %s1482_s20 }
  0x4f   : > { %692 = vrot.lane.b32.xlu0 %v1678_v6, %s1483_s30  ;;  %694 = vrot.lane.b32.xlu1 %v1688_v8, %s1483_s30 }
  0x53   : > { %690 = vrot.lane.b32.xlu0 %v1681_v7, %s1483_s30  ;;  %683 = vrot.lane.b32.xlu1 %v1678_v6, %s1484_s18 }
  0x57   : > { %685 = vrot.lane.b32.xlu0 %v1688_v8, %s1484_s18  ;;  %681 = vrot.lane.b32.xlu1 %v1681_v7, %s1484_s18 }
  0x5b   : > { %674 = vrot.lane.b32.xlu0 %v1678_v6, %s1485_s19  ;;  %676 = vrot.lane.b32.xlu1 %v1688_v8, %s1485_s19 }
  0x5f   : > { %672 = vrot.lane.b32.xlu0 %v1681_v7, %s1485_s19  ;;  %737 = vrot.lane.b32.xlu1 %v1678_v6, %s1952_s13 }
  0x63   : > { %739 = vrot.lane.b32.xlu0 %v1688_v8, %s1952_s13  ;;  %735 = vrot.lane.b32.xlu1 %v1681_v7, %s1952_s13  ;;  %s641_s13 = scalar_lea.vmem %s1938_s4, %s1982_s16  ;;  %s1968_s16 = sld [smem:[#allocation12_spill]] }
  0xa9   : > { %v729_v9 = vpop.permute.xlu0 %728  ;;  %v727_v10 = vpop.permute.xlu1 %726 }
  0xaa   : > { %v733_v29 = vsel %vm732_vm0, %v727_v10, %v729_v9 }
  0xad   : > { %v731_v11 = vpop.permute.xlu0 %730  ;;  %v720_v12 = vpop.permute.xlu1 %719 }
  0xae   : > { %801 = vrot.lane.b32.xlu1 %v731_v11, %s1487_s29  ;;  %v734_v27 = vsel %vm732_vm0, %v729_v9, %v731_v11 }
  0xb1   : > { %v722_v13 = vpop.permute.xlu0 %721  ;;  %v718_v14 = vpop.permute.xlu1 %717 }
  0xb2   : > { %795 = vrot.lane.b32.xlu0 %v722_v13, %s1487_s29  ;;  %v725_v30 = vsel %vm723_vm1, %v720_v12, %v722_v13  ;;  %v724_v32 = vsel %vm723_vm1, %v718_v14, %v720_v12 }
  0xb5   : > { %v711_v15 = vpop.permute.xlu0 %710  ;;  %v713_v16 = vpop.permute.xlu1 %712 }
  0xb6   : > { %789 = vrot.lane.b32.xlu1 %v713_v16, %s1487_s29  ;;  %v716_v31 = vsel %vm714_vm2, %v711_v15, %v713_v16 }
  0xb9   : > { %v709_v17 = vpop.permute.xlu0 %708  ;;  %v702_v18 = vpop.permute.xlu1 %701 }
  0xba   : > { %v715_v33 = vsel %vm714_vm2, %v709_v17, %v711_v15 }
  0xbd   : > { %v704_v19 = vpop.permute.xlu0 %703  ;;  %v700_v20 = vpop.permute.xlu1 %699 }
  0xbe   : > { %783 = vrot.lane.b32.xlu0 %v704_v19, %s1487_s29  ;;  %v707_v34 = vsel %vm705_vm3, %v702_v18, %v704_v19  ;;  %v706_v36 = vsel %vm705_vm3, %v700_v20, %v702_v18 }
  0xc1   : > { %v693_v21 = vpop.permute.xlu0 %692  ;;  %v695_v22 = vpop.permute.xlu1 %694 }
  0xc2   : > { %777 = vrot.lane.b32.xlu1 %v695_v22, %s1487_s29  ;;  %v698_v35 = vsel %vm696_vm4, %v693_v21, %v695_v22 }
  0xc5   : > { %v691_v23 = vpop.permute.xlu0 %690  ;;  %v684_v24 = vpop.permute.xlu1 %683 }
  0xc6   : > { %v697_v37 = vsel %vm696_vm4, %v691_v23, %v693_v21 }
  0xc9   : > { %v686_v25 = vpop.permute.xlu0 %685  ;;  %v682_v26 = vpop.permute.xlu1 %681 }
  0xca   : > { %771 = vrot.lane.b32.xlu0 %v686_v25, %s1487_s29  ;;  %v689_v38 = vsel %vm687_vm5, %v684_v24, %v686_v25  ;;  %v688_v40 = vsel %vm687_vm5, %v682_v26, %v684_v24 }
  0xcd   : > { %v677_v28 = vpop.permute.xlu1 %676  ;;  %v675_v39 = vpop.permute.xlu0 %674 }
  0xce   : > { %799 = vrot.lane.b32.xlu0 %v734_v27, %s1487_s29  ;;  %765 = vrot.lane.b32.xlu1 %v677_v28, %s1487_s29  ;;  %v680_v42 = vsel %vm678_vm6, %v675_v39, %v677_v28 }
  0xd1   : > { %v673_v41 = vpop.permute.xlu0 %672  ;;  %v738_v44 = vpop.permute.xlu1 %737 }
  0xd2   : > { %797 = vrot.lane.b32.xlu0 %v733_v29, %s1487_s29  ;;  %793 = vrot.lane.b32.xlu1 %v725_v30, %s1487_s29  ;;  %v679_v46 = vsel %vm678_vm6, %v673_v41, %v675_v39 }
  0xd5   : > { %v740_v45 = vpop.permute.xlu0 %739  ;;  %v736_v49 = vpop.permute.xlu1 %735 }
  0xd6   : > { %787 = vrot.lane.b32.xlu0 %v716_v31, %s1487_s29  ;;  %791 = vrot.lane.b32.xlu1 %v724_v32, %s1487_s29  ;;  %v743_v48 = vsel %vm741_vm8, %v738_v44, %v740_v45  ;;  %v742_v51 = vsel %vm741_vm8, %v736_v49, %v738_v44 }
  0xda   : > { %785 = vrot.lane.b32.xlu0 %v715_v33, %s1487_s29  ;;  %781 = vrot.lane.b32.xlu1 %v707_v34, %s1487_s29 }
  0xde   : > { %775 = vrot.lane.b32.xlu0 %v698_v35, %s1487_s29  ;;  %779 = vrot.lane.b32.xlu1 %v706_v36, %s1487_s29 }
  0xe2   : > { %773 = vrot.lane.b32.xlu0 %v697_v37, %s1487_s29  ;;  %769 = vrot.lane.b32.xlu1 %v689_v38, %s1487_s29  ;;  %v1417_v38 = vld [vmem:[%s1939_s5] ss:$8 sps:$4 sm:$0xff]  }
  0xe6   : > { %759 = vrot.lane.b32.xlu0 %v1688_v8, %s1487_s29  ;;  %767 = vrot.lane.b32.xlu1 %v688_v40, %s1487_s29  ;;  %v931_v40 = vlaneseq }
  0xe8   : > { %v932_v41 = vshrl.u32 %v931_v40, 7 }
  0xea   : > { %763 = vrot.lane.b32.xlu0 %v680_v42, %s1487_s29  ;;  %757 = vrot.lane.b32.xlu1 %v1678_v6, %s1487_s29 }
  0xee   : > { %761 = vrot.lane.b32.xlu0 %v679_v46, %s1487_s29  ;;  %755 = vrot.lane.b32.xlu1 %v1681_v7, %s1487_s29  ;;  %v671_v46 = vld [vmem:[%s641_s13] sm:$0x1] }
  0xf2   : > { %805 = vrot.lane.b32.xlu0 %v743_v48, %s1487_s29  ;;  %807 = vrot.lane.b32.xlu1 %v740_v45, %s1487_s29 }
  0xf6   : > { %803 = vrot.lane.b32.xlu0 %v742_v51, %s1487_s29  ;;  %897 = vperm.xlu1 %1402, %v893_v50   ;;  %v929_v51 = vunpack.c.l.bf16 %v670_v43 }
  0xfa   : > { %902 = vperm.xlu0 %1403, %v894_v52   ;;  %913 = vperm.xlu1 %1402, %v909_v53   ;;  %v1829_v52 = vsub.s32 0, %v932_v41 }
  0xfe   : > { %918 = vperm.xlu1 %1402, %v910_v54  }
 0x120   : > { %v802_v56 = vpop.permute.xlu1 %801 }
 0x124   : > { %v796_v55 = vpop.permute.xlu0 %795 }
 0x128   : > { %v790_v58 = vpop.permute.xlu1 %789 }
 0x130   : > { %v784_v57 = vpop.permute.xlu0 %783 }
 0x134   : > { %v778_v60 = vpop.permute.xlu1 %777 }
 0x13c   : > { %v772_v59 = vpop.permute.xlu0 %771 }
 0x140   : > { %v800_v61 = vpop.permute.xlu0 %799  ;;  %v766_v62 = vpop.permute.xlu1 %765 }
 0x141   : > { %v825_v63 = vsel %vm809_vm9, %v800_v61, %v802_v56  ;;  %v930_v56 = vunpack.c.l.bf16 %v671_v46  ;;  %v1420_v46 = vld [vmem:[%s1942_s8] ss:$8 sps:$4 sm:$0xff]  }
 0x142   : > { %850 = vmatprep.subr.bf16.mxu0 %v825_v63 }
 0x144   : > { %v798_v0 = vpop.permute.xlu0 %797  ;;  %v794_v1 = vpop.permute.xlu1 %793 }
 0x145   : > { %v824_v2 = vsel %vm809_vm9, %v798_v0, %v800_v61  ;;  %v823_v3 = vsel %vm809_vm9, %v794_v1, %v796_v55  ;;  %v934_v61 = vrot.slane %v929_v51, %v1829_v52 }
 0x146   : > { %851 = vmatpush1.bf16.msra.mxu0 %v824_v2 }
 0x147   : > { %852 = vmatprep.subr.bf16.mxu0 %v823_v3 }
 0x148   : > { %v788_v4 = vpop.permute.xlu0 %787  ;;  %v792_v5 = vpop.permute.xlu1 %791 }
 0x149   : > { %v821_v8 = vsel %vm809_vm9, %v788_v4, %v790_v58  ;;  %v822_v9 = vsel %vm809_vm9, %v792_v5, %v794_v1  ;;  %v938_v1 = vrot.slane %v930_v56, %v1829_v52 }
 0x14a   : > { %853 = vmatpush1.bf16.msra.mxu0 %v822_v9 }
 0x14b   : > { %854 = vmatprep.subr.bf16.mxu0 %v821_v8 }
 0x14c   : > { %v786_v10 = vpop.permute.xlu0 %785  ;;  %v782_v11 = vpop.permute.xlu1 %781 }
 0x14d   : > { %v820_v12 = vsel %vm809_vm9, %v786_v10, %v788_v4  ;;  %v819_v13 = vsel %vm809_vm9, %v782_v11, %v784_v57 }
 0x14e   : > { %855 = vmatpush1.bf16.msra.mxu0 %v820_v12 }
 0x14f   : > { %856 = vmatprep.subr.bf16.mxu0 %v819_v13  ;;  %v1422_v13 = vld [vmem:[%s1942_s8 + $0x4] ss:$8 sps:$4 sm:$0xff]  }
 0x150   : > { %v776_v14 = vpop.permute.xlu0 %775  ;;  %v780_v15 = vpop.permute.xlu1 %779  ;;  %1321 = vmatprep.mubr.msk.bf16.mxu1 %vm846_vm7, %v1422_v13 }
 0x151   : > { %v817_v16 = vsel %vm809_vm9, %v776_v14, %v778_v60  ;;  %v818_v17 = vsel %vm809_vm9, %v780_v15, %v782_v11  ;;  %v1051_v15 = vld [vmem:[%s1943_s9 + $0x8] sm:$0xff] }
 0x152   : > { %857 = vmatpush1.bf16.msra.mxu0 %v818_v17  ;;  %v1078_v17 = vunpack.c.l.bf16 %v1681_v7 }
 0x153   : > { %858 = vmatprep.subr.bf16.mxu0 %v817_v16  ;;  %v1064_v16 = vld [vmem:[%s1968_s16] sm:$0xff] }
 0x154   : > { %v774_v18 = vpop.permute.xlu0 %773  ;;  %v770_v19 = vpop.permute.xlu1 %769 }
 0x155   : > { %v816_v20 = vsel %vm809_vm9, %v774_v18, %v776_v14  ;;  %v815_v21 = vsel %vm809_vm9, %v770_v19, %v772_v59  ;;  %v1050_v14 = vld [vmem:[%s1943_s9] sm:$0xff]  ;;  %v1079_v18 = vunpack.c.l.bf16 %v1678_v6 }
 0x156   : > { %859 = vmatpush1.bf16.msra.mxu0 %v816_v20  ;;  %v1081_v20 = vunpack.c.h.bf16 %v1678_v6 }
 0x157   : > { %860 = vmatprep.subr.bf16.mxu0 %v815_v21  ;;  %v1065_v21 = vld [vmem:[%s1968_s16 + $0x8] sm:$0xff] }
 0x158   : > { %v760_v22 = vpop.permute.xlu0 %759  ;;  %v768_v23 = vpop.permute.xlu1 %767 }
 0x159   : > { %v814_v24 = vsel %vm809_vm9, %v768_v23, %v770_v19  ;;  %v1080_v19 = vunpack.c.h.bf16 %v1681_v7 }
 0x15a   : > { %861 = vmatpush1.bf16.msra.mxu0 %v814_v24 }
 0x15b   : > { %v1409_v23 = vpack.i.bf16 %v1081_v20, %v1080_v19 }
 0x15c   : > { %v764_v25 = vpop.permute.xlu0 %763  ;;  %v758_v26 = vpop.permute.xlu1 %757 }
 0x15d   : > { %v813_v27 = vsel %vm809_vm9, %v764_v25, %v766_v62  ;;  %v811_v31 = vsel %vm809_vm9, %v758_v26, %v760_v22  ;;  %v1404_v22 = vpack.i.bf16 %v1079_v18, %v1078_v17 }
 0x15e   : > { %862 = vmatprep.subr.bf16.mxu0 %v813_v27 }
 0x160   : > { %v762_v28 = vpop.permute.xlu0 %761  ;;  %v756_v29 = vpop.permute.xlu1 %755 }
 0x161   : > { %v812_v30 = vsel %vm809_vm9, %v762_v28, %v764_v25  ;;  %v810_v34 = vsel %vm809_vm9, %v756_v29, %v758_v26 }
 0x162   : > { %863 = vmatpush1.bf16.msra.mxu0 %v812_v30 }
 0x163   : > { %864 = vmatprep.subr.bf16.mxu0 %v811_v31 }
 0x164   : > { %v806_v32 = vpop.permute.xlu0 %805  ;;  %v808_v33 = vpop.permute.xlu1 %807 }
 0x165   : > { %v827_v35 = vsel %vm809_vm9, %v806_v32, %v808_v33 }
 0x166   : > { %865 = vmatpush1.bf16.msra.mxu0 %v810_v34 }
 0x167   : > { %880 = vmatprep.subr.bf16.mxu0 %v827_v35 }
 0x168   : > { %v804_v36 = vpop.permute.xlu0 %803 }
 0x169   : > { %v826_v37 = vsel %vm809_vm9, %v804_v36, %v806_v32 }
 0x16a   : > { %881 = vmatpush2.bf16.msra.mxu0 %v826_v37 }
 0x16d   : > { %883 = vmatmul.mubr.bf16.vlgmr.msra.gmra.mxu0 %v1417_v38 }
 0x171   : > { %v898_v39 = vpop.permute.xlu1 %897 }
 0x175   : > { %v914_v42 = vpop.permute.xlu1 %913  ;;  %v903_v49 = vpop.permute.xlu0 %902 }
 0x179   : > { %v919_v58 = vpop.permute.xlu1 %918 }
 0x22d   : > { %v884_v44 = vpop.f32.mrf.mxu0 }
 0x22e   : > { %v905_v45 = vmul.f32 %v898_v39, %v884_v44 }
 0x22f   : > { %v886_v48 = vpop.f32.mrf.mxu0 }
 0x230   : > { %v921_v50 = vadd.f32 %v914_v42, %v905_v45  ;;  %v906_v53 = vmul.f32 %v898_v39, %v886_v48 }
 0x231   : > { %v888_v54 = vpop.f32.mrf.mxu0 }
 0x232   : > { %v922_v55 = vadd.f32 %v914_v42, %v906_v53  ;;  %v907_v57 = vmul.f32 %v903_v49, %v888_v54  ;;  %v925_v60 = vmax.f32 %v921_v50, 0.0 }
 0x233   : > { %v890_v59 = vpop.f32.mrf.mxu0 }
 0x234   : > { %v923_v62 = vadd.f32 %v919_v58, %v907_v57  ;;  %v908_v63 = vmul.f32 %v903_v49, %v890_v59  ;;  %v926_v0 = vmax.f32 %v922_v55, 0.0  ;;  %v939_v4 = vmul.f32 %v934_v61, %v925_v60 }
 0x236   : > { %v927_v2 = vmax.f32 %v923_v62, 0.0  ;;  %v924_v3 = vadd.f32 %v919_v58, %v908_v63  ;;  %v940_v9 = vmul.f32 %v938_v1, %v926_v0 }
 0x238   : > { %v941_v5 = vmul.f32 %v934_v61, %v927_v2  ;;  %v928_v8 = vmax.f32 %v924_v3, 0.0 }
 0x23a   : > { %v1833_v10 = vpack.c.bf16 %v941_v5, %v939_v4  ;;  %v942_v11 = vmul.f32 %v938_v1, %v928_v8 }
 0x23c   : > { %v944_v12 = vpack.c.bf16 %v942_v11, %v940_v9  ;;  %983 = vrot.lane.b32.xlu0 %v1833_v10, %s1479_s11 }
 0x23e   : > { %985 = vrot.lane.b32.xlu1 %v944_v12, %s1479_s11 }
 0x240   : > { %977 = vrot.lane.b32.xlu0 %v1833_v10, %s1480_s25 }
 0x242   : > { %979 = vrot.lane.b32.xlu1 %v944_v12, %s1480_s25  ;;  %s1969_s25 = sld [smem:[#allocation13_spill]] }
 0x244   : > { %971 = vrot.lane.b32.xlu0 %v1833_v10, %s1481_s21 }
 0x246   : > { %973 = vrot.lane.b32.xlu1 %v944_v12, %s1481_s21  ;;  %s1967_s21 = smov 106  }
 0x248   : > { %965 = vrot.lane.b32.xlu0 %v1833_v10, %s1482_s20 }
 0x24a   : > { %967 = vrot.lane.b32.xlu1 %v944_v12, %s1482_s20  ;;  %s632_s20 = scalar_lea.vmem [#allocation5], %s1676_s17 }
 0x24c   : > { %959 = vrot.lane.b32.xlu0 %v1833_v10, %s1483_s30 }
 0x24e   : > { %961 = vrot.lane.b32.xlu1 %v944_v12, %s1483_s30 }
 0x250   : > { %953 = vrot.lane.b32.xlu0 %v1833_v10, %s1484_s18 }
 0x252   : > { %955 = vrot.lane.b32.xlu1 %v944_v12, %s1484_s18  ;;  %s1325_s18 = sshll.u32 (%p1646_p11), %s1591_s28, 2 }
 0x254   : > { %947 = vrot.lane.b32.xlu0 %v1833_v10, %s1485_s19 }
 0x256   : > { %949 = vrot.lane.b32.xlu1 %v944_v12, %s1485_s19  ;;  %s1127_s19 = scalar_lea.vmem (%p1646_p11), %s1971_s14, %s1325_s18 }
 0x258   : > { %989 = vrot.lane.b32.xlu0 %v1833_v10, %s1967_s21 }
 0x25a   : > { %991 = vrot.lane.b32.xlu1 %v944_v12, %s1967_s21  ;;  %s645_s21 = scalar_lea.vmem %s1969_s25, %s644_s10 }
 0x25b   : > { %v1101_v55 = vld [vmem:[%s645_s21] sm:$0x1] }
 0x25c   : > { %1054 = vperm.xlu0 %1403, %v1050_v14   ;;  %v1102_v63 = vunpack.c.l.bf16 %v1101_v55 }
 0x25e   : > { %1059 = vperm.xlu1 %1402, %v1051_v15   ;;  %v1106_v5 = vrot.slane %v1102_v63, %v1829_v52 }
 0x260   : > { %1068 = vperm.xlu0 %1403, %v1064_v16  }
 0x262   : > { %1073 = vperm.xlu1 %1402, %v1065_v21  }
 0x264   : > { %1405 = vrot.lane.b32.xlu0 %v1404_v22, %s1489_s15 }
 0x266   : > { %1410 = vrot.lane.b32.xlu1 %v1409_v23, %s1489_s15 }
 0x2ae   : > { %v984_v24 = vpop.permute.xlu0 %983 }
 0x2b0   : > { %v986_v25 = vpop.permute.xlu1 %985 }
 0x2b1   : > { %v987_v26 = vsel %vm732_vm0, %v984_v24, %v986_v25 }
 0x2b2   : > { %1010 = vmatpush1.bf16.msra.mxu1 %v987_v26  ;;  %v978_v27 = vpop.permute.xlu0 %977 }
 0x2b3   : > { %1011 = vmatprep.subr.bf16.mxu1 %v1488_v47 }
 0x2b4   : > { %v980_v6 = vpop.permute.xlu1 %979 }
 0x2b5   : > { %v981_v7 = vsel %vm723_vm1, %v978_v27, %v980_v6 }
 0x2b6   : > { %1012 = vmatpush1.bf16.msra.mxu1 %v981_v7  ;;  %v972_v28 = vpop.permute.xlu0 %971 }
 0x2b7   : > { %1013 = vmatprep.subr.bf16.mxu1 %v1488_v47 }
 0x2b8   : > { %v974_v29 = vpop.permute.xlu1 %973 }
 0x2b9   : > { %v975_v30 = vsel %vm714_vm2, %v972_v28, %v974_v29 }
 0x2ba   : > { %1014 = vmatpush1.bf16.msra.mxu1 %v975_v30  ;;  %v966_v31 = vpop.permute.xlu0 %965 }
 0x2bb   : > { %1015 = vmatprep.subr.bf16.mxu1 %v1488_v47 }
 0x2bc   : > { %v968_v32 = vpop.permute.xlu1 %967 }
 0x2bd   : > { %v969_v33 = vsel %vm705_vm3, %v966_v31, %v968_v32 }
 0x2be   : > { %1016 = vmatpush1.bf16.msra.mxu1 %v969_v33  ;;  %v960_v34 = vpop.permute.xlu0 %959 }
 0x2bf   : > { %1017 = vmatprep.subr.bf16.mxu1 %v1488_v47 }
 0x2c0   : > { %v962_v35 = vpop.permute.xlu1 %961 }
 0x2c1   : > { %v963_v36 = vsel %vm696_vm4, %v960_v34, %v962_v35 }
 0x2c2   : > { %1018 = vmatpush1.bf16.msra.mxu1 %v963_v36  ;;  %v954_v37 = vpop.permute.xlu0 %953 }
 0x2c3   : > { %1019 = vmatprep.subr.bf16.mxu1 %v1488_v47 }
 0x2c4   : > { %v956_v38 = vpop.permute.xlu1 %955 }
 0x2c5   : > { %v957_v39 = vsel %vm687_vm5, %v954_v37, %v956_v38 }
 0x2c6   : > { %1020 = vmatpush1.bf16.msra.mxu1 %v957_v39  ;;  %v948_v40 = vpop.permute.xlu0 %947 }
 0x2c7   : > { %1021 = vmatprep.subr.bf16.mxu1 %v1488_v47 }
 0x2c8   : > { %v950_v41 = vpop.permute.xlu1 %949 }
 0x2c9   : > { %v951_v42 = vsel %vm678_vm6, %v948_v40, %v950_v41 }
 0x2ca   : > { %1022 = vmatpush1.bf16.msra.mxu1 %v951_v42  ;;  %v990_v44 = vpop.permute.xlu0 %989 }
 0x2cb   : > { %1023 = vmatprep.subr.bf16.mxu1 %v1488_v47 }
 0x2cc   : > { %v992_v43 = vpop.permute.xlu1 %991 }
 0x2cd   : > { %v993_v45 = vsel %vm741_vm8, %v990_v44, %v992_v43 }
 0x2ce   : > { %1024 = vmatpush1.bf16.msra.mxu1 %v1833_v10 }
 0x2cf   : > { %1039 = vmatprep.subr.bf16.mxu1 %v1488_v47 }
 0x2d2   : > { %1040 = vmatpush2.bf16.msra.mxu1 %v993_v45 }
 0x2d5   : > { %1042 = vmatmul.mubr.bf16.vlgmr.msra.gmra.mxu1 %v1420_v46 }
 0x2d7   : > { %v1055_v48 = vpop.permute.xlu0 %1054 }
 0x2d9   : > { %v1060_v49 = vpop.permute.xlu1 %1059 }
 0x2db   : > { %v1069_v50 = vpop.permute.xlu0 %1068 }
 0x2dd   : > { %v1074_v51 = vpop.permute.xlu1 %1073 }
 0x2df   : > { %v1406_v47 = vpop.permute.xlu0 %1405 }
 0x2e0   : > { %v1408_v56 = vunpack.i.h.bf16 %v1406_v47  ;;  %v1407_v57 = vunpack.i.l.bf16 %v1406_v47 }
 0x2e1   : > { %v1411_v53 = vpop.permute.xlu1 %1410 }
 0x2e2   : > { %v1413_v60 = vunpack.i.h.bf16 %v1411_v53  ;;  %v1412_v61 = vunpack.i.l.bf16 %v1411_v53  ;;  %v1095_v0 = vsel %vm1094_vm10, %v1407_v57, %v1408_v56 }
 0x2e4   : > { %v1096_v3 = vsel %vm1094_vm10, %v1412_v61, %v1413_v60 }
 0x395   : > { %v1043_v54 = vpop.f32.mrf.mxu1 }
 0x396   : > { %v1062_v58 = vmul.f32 %v1055_v48, %v1043_v54 }
 0x397   : > { %v1045_v59 = vpop.f32.mrf.mxu1 }
 0x398   : > { %v1076_v62 = vadd.f32 %v1069_v50, %v1062_v58 }
 0x399   : > { %v1046_v1 = vpop.f32.mrf.mxu1 }
 0x39a   : > { %v1063_v2 = vmul.f32 %v1060_v49, %v1046_v1  ;;  %v1099_v8 = vadd.f32 %v1095_v0, %v1076_v62 }
 0x39b   : > { %v1048_v4 = vpop.f32.mrf.mxu1 }
 0x39c   : > { %v1077_v9 = vadd.f32 %v1074_v51, %v1063_v2  ;;  %v1107_v11 = vmul.f32 %v1106_v5, %v1099_v8 }
 0x39e   : > { %v1100_v10 = vadd.f32 %v1096_v3, %v1077_v9 }
 0x3a0   : > { %v1108_v12 = vmul.f32 %v1106_v5, %v1100_v10  ;;  %1125 = sbr.rel (!%p1646_p11) target bundleno = 941 (0x3ad), region = 195 }
 0x3a2   : > { %v1333_v13 = vpack.c.bf16 %v1108_v12, %v1107_v11 }
 0x3a4   : > { %1334 = vst [vmem:[%s632_s20] sm:$0xff] %v1333_v13  }
 0x3ab   : > { %v1144_v14 = vld [vmem:[%s632_s20] sm:$0xf]  ;;  %v1146_v15 = vld [vmem:[%s632_s20 + $0x4] sm:$0xf] }
 0x3ac   : > { %1145 = vst [vmem:[%s1127_s19] sm:$0xf] %v1144_v14  ;;  %1147 = vst [vmem:[%s1127_s19 + $0x8] sm:$0xf] %v1146_v15 }
 0x3ad PF: > { %s1972_s27 = sld [smem:[#allocation7_spill]]  ;;  %s1977_s21 = smov %s1457_s22 }
 0x3ae   : > { %s1973_s12 = sld [smem:[#allocation10_spill]]  ;;  %s1979_s23 = smov %s1465_s24 }
 0x3af   : > { %s1974_s17 = sld [smem:[#allocation9_spill]] }
 0x3b0   : > { %s1975_s25 = sld [smem:[#allocation6_spill]] }
 0x3b1   : > { %s1976_s26 = sld [smem:[#allocation8_spill]] }
 0x3b3   : > { %p19_p5 = scmp.ge.s32.totalorder %s1972_s27, 4  }
 0x3b4   : > { %s1978_s22 = smov %s1973_s12 }
 0x3b5   : > { %s1980_s24 = smov %s1974_s17  ;;  %21 = sbr.rel (!%p19_p5) target bundleno = 8 (0x8), region = 292 }

// kernel: stem_forward.5
= control target key start
LH: loop header
LB: loop body
LE: loop exit
PB: predicated region body
PF: predicated region fallthrough
CT: control target
= control target key end

     0   :  { %s1093_s15 = smov 127   ;;  %s1094_s16 = smov 122   ;;  %v1096_v25 = vmov 0   ;;  %vm302_vm0 = vcmask 998400   ;;  %vm252_vm1 = vcmask 1039360   ;;  %vm277_vm2 = vcmask 1006592   ;;  %s1492_s0 = inlined_call_operand.vmem [shape: bf16[64,256], index: 0, kind: input, shape index: {}, may-alias: {0,1}]   ;;  %s1493_s1 = inlined_call_operand.vmem [shape: bf16[64,256], index: 1, kind: input, shape index: {}, may-alias: {0,1}]   ;;  %s1494_s2 = inlined_call_operand.vmem [shape: bf16[128,256], index: 2, kind: input, shape index: {}]   ;;  %s1495_s3 = inlined_call_operand.vmem [shape: f32[128,1], index: 3, kind: input, shape index: {}]   ;;  %s1496_s4 = inlined_call_operand.vmem [shape: f32[128,1], index: 4, kind: input, shape index: {}]   ;;  %s1497_s5 = inlined_call_operand.vmem [shape: bf16[32,128], index: 5, kind: input, shape index: {}]   ;;  %s1498_s6 = inlined_call_operand.vmem [shape: f32[32,1], index: 6, kind: input, shape index: {}]   ;;  %s1499_s7 = inlined_call_operand.vmem [shape: f32[32,1], index: 7, kind: input, shape index: {}]   ;;  %s1500_s8 = inlined_call_operand.vmem [shape: bf16[32,128], index: 8, kind: output, shape index: {}]  }
   0x1   :  { %v43_v0 = vld [vmem:[%s1492_s0 + $0x30] sm:$0xf]  ;;  %v45_v1 = vld [vmem:[%s1492_s0 + $0x38] sm:$0xf]  ;;  %v912_v2 = vld [vmem:[%s1493_s1 + $0x34] sm:$0xf]  ;;  %1058 = vset.pattern.permute.xlu1 %v1096_v25  ;;  %1057 = vset.pattern.permute.xlu0 %v1096_v25 }
   0x2   :  { %44 = vst [vmem:[#allocation2 + $0x18] sm:$0xf] %v43_v0  ;;  %46 = vst [vmem:[#allocation2 + $0x1c] sm:$0xf] %v45_v1  ;;  %v913_v3 = vld [vmem:[%s1493_s1 + $0x3c] sm:$0xf] }
   0x3   :  { %v910_v4 = vld [vmem:[%s1493_s1 + $0x24] sm:$0xf]  ;;  %118 = vst [vmem:[#allocation3 + $0x18] sm:$0xf] %v912_v2  ;;  %120 = vst [vmem:[#allocation3 + $0x1c] sm:$0xf] %v913_v3 }
   0x4   :  { %114 = vst [vmem:[#allocation3 + $0x10] sm:$0xf] %v910_v4  ;;  %v911_v5 = vld [vmem:[%s1493_s1 + $0x2c] sm:$0xf]  ;;  %v39_v6 = vld [vmem:[%s1492_s0 + $0x20] sm:$0xf] }
   0x5   :  { %v41_v7 = vld [vmem:[%s1492_s0 + $0x28] sm:$0xf]  ;;  %116 = vst [vmem:[#allocation3 + $0x14] sm:$0xf] %v911_v5  ;;  %40 = vst [vmem:[#allocation2 + $0x10] sm:$0xf] %v39_v6 }
   0x6   :  { %42 = vst [vmem:[#allocation2 + $0x14] sm:$0xf] %v41_v7  ;;  %v908_v8 = vld [vmem:[%s1493_s1 + $0x14] sm:$0xf]  ;;  %v909_v9 = vld [vmem:[%s1493_s1 + $0x1c] sm:$0xf] }
   0x7   :  { %v35_v10 = vld [vmem:[%s1492_s0 + $0x10] sm:$0xf]  ;;  %110 = vst [vmem:[#allocation3 + $0x8] sm:$0xf] %v908_v8  ;;  %112 = vst [vmem:[#allocation3 + $0xc] sm:$0xf] %v909_v9 }
   0x8   :  { %36 = vst [vmem:[#allocation2 + $0x8] sm:$0xf] %v35_v10  ;;  %v37_v11 = vld [vmem:[%s1492_s0 + $0x18] sm:$0xf]  ;;  %v906_v12 = vld [vmem:[%s1493_s1 + $0x4] sm:$0xf] }
   0x9   :  { %v907_v13 = vld [vmem:[%s1493_s1 + $0xc] sm:$0xf]  ;;  %38 = vst [vmem:[#allocation2 + $0xc] sm:$0xf] %v37_v11  ;;  %106 = vst [vmem:[#allocation3] sm:$0xf] %v906_v12 }
   0xa   :  { %108 = vst [vmem:[#allocation3 + $0x4] sm:$0xf] %v907_v13  ;;  %v31_v14 = vld [vmem:[%s1492_s0] sm:$0xf]  ;;  %v33_v15 = vld [vmem:[%s1492_s0 + $0x8] sm:$0xf] }
   0xb   :  { %32 = vst [vmem:[#allocation2] sm:$0xf] %v31_v14  ;;  %34 = vst [vmem:[#allocation2 + $0x4] sm:$0xf] %v33_v15  ;;  %v1190_v16 = vld [vmem:[#allocation2 + $0x18] sm:$0xff]   ;;  %s1095_s0 = smov 123  }
   0xc   :  { %248 = vrot.lane.b32.xlu1 %v1190_v16, %s1093_s15  ;;  %298 = vrot.lane.b32.xlu0 %v1190_v16, %s1094_s16  ;;  %v1060_v17 = vld [vmem:[#allocation3 + $0x18] sm:$0xff]   ;;  %v1061_v18 = vld [vmem:[#allocation3 + $0x10] sm:$0xff]   ;;  %v1069_v24 = vld [vmem:[%s1494_s2 + $0x4] ss:$8 sps:$4 sm:$0xff]  }
   0xd   :  { %v1194_v19 = vld [vmem:[#allocation2 + $0x10] sm:$0xff]   ;;  %439 = vmatprep.mubr.bf16.mxu0 %v1069_v24  ;;  %v519_v26 = vld [vmem:[%s1495_s3 + $0x78] sm:$0xff]  ;;  %v516_v29 = vld [vmem:[%s1495_s3 + $0x60] sm:$0xff] }
   0xe   :  { %v1063_v20 = vld [vmem:[#allocation3 + $0x8] sm:$0xff]   ;;  %v630_v27 = vld [vmem:[%s1496_s4 + $0x70] sm:$0xff]  ;;  %v631_v30 = vld [vmem:[%s1496_s4 + $0x78] sm:$0xff] }
   0xf   :  { %v518_v28 = vld [vmem:[%s1495_s3 + $0x70] sm:$0xff]  ;;  %v628_v31 = vld [vmem:[%s1496_s4 + $0x60] sm:$0xff]  ;;  %v517_v32 = vld [vmem:[%s1495_s3 + $0x68] sm:$0xff] }
  0x10   :  { %250 = vrot.lane.b32.xlu1 %v1060_v17, %s1093_s15  ;;  %300 = vrot.lane.b32.xlu0 %v1060_v17, %s1094_s16  ;;  %v1198_v21 = vld [vmem:[#allocation2 + $0x8] sm:$0xff]   ;;  %v514_v33 = vld [vmem:[%s1495_s3 + $0x50] sm:$0xff]  ;;  %v515_v36 = vld [vmem:[%s1495_s3 + $0x58] sm:$0xff] }
  0x11   :  { %v1065_v22 = vld [vmem:[#allocation3] sm:$0xff]   ;;  %v629_v34 = vld [vmem:[%s1496_s4 + $0x68] sm:$0xff]  ;;  %v626_v35 = vld [vmem:[%s1496_s4 + $0x50] sm:$0xff] }
  0x12   :  { %v1202_v23 = vld [vmem:[#allocation2] sm:$0xff]   ;;  %v627_v38 = vld [vmem:[%s1496_s4 + $0x58] sm:$0xff]  ;;  %v513_v40 = vld [vmem:[%s1495_s3 + $0x48] sm:$0xff] }
  0x13   :  { %v512_v37 = vld [vmem:[%s1495_s3 + $0x40] sm:$0xff]  ;;  %v510_v41 = vld [vmem:[%s1495_s3 + $0x30] sm:$0xff]  ;;  %v625_v42 = vld [vmem:[%s1496_s4 + $0x48] sm:$0xff] }
  0x14   :  { %296 = vrot.lane.b32.xlu1 %v1061_v18, %s1094_s16  ;;  %294 = vrot.lane.b32.xlu0 %v1194_v19, %s1094_s16  ;;  %v624_v39 = vld [vmem:[%s1496_s4 + $0x40] sm:$0xff]  ;;  %v622_v43 = vld [vmem:[%s1496_s4 + $0x30] sm:$0xff] }
  0x15   :  { %v511_v44 = vld [vmem:[%s1495_s3 + $0x38] sm:$0xff]  ;;  %v508_v45 = vld [vmem:[%s1495_s3 + $0x20] sm:$0xff]  ;;  %v509_v48 = vld [vmem:[%s1495_s3 + $0x28] sm:$0xff] }
  0x16   :  { %v623_v46 = vld [vmem:[%s1496_s4 + $0x38] sm:$0xff]  ;;  %v620_v47 = vld [vmem:[%s1496_s4 + $0x20] sm:$0xff]  ;;  %v506_v49 = vld [vmem:[%s1495_s3 + $0x10] sm:$0xff] }
  0x17   :  { %v621_v50 = vld [vmem:[%s1496_s4 + $0x28] sm:$0xff]  ;;  %v618_v51 = vld [vmem:[%s1496_s4 + $0x10] sm:$0xff]  ;;  %v507_v52 = vld [vmem:[%s1495_s3 + $0x18] sm:$0xff] }
  0x18   :  { %246 = vrot.lane.b32.xlu1 %v1061_v18, %s1093_s15  ;;  %244 = vrot.lane.b32.xlu0 %v1194_v19, %s1093_s15  ;;  %v504_v53 = vld [vmem:[%s1495_s3] sm:$0xff]  ;;  %v619_v54 = vld [vmem:[%s1496_s4 + $0x18] sm:$0xff] }
  0x19   :  { %v616_v55 = vld [vmem:[%s1496_s4] sm:$0xff]  ;;  %v505_v56 = vld [vmem:[%s1495_s3 + $0x8] sm:$0xff]  ;;  %v819_v62 = vld [vmem:[%s1498_s6 + $0x10] sm:$0xff] }
  0x1a   :  { %v617_v57 = vld [vmem:[%s1496_s4 + $0x8] sm:$0xff]  ;;  %v817_v58 = vld [vmem:[%s1498_s6] sm:$0xff]  ;;  %v820_v1 = vld [vmem:[%s1498_s6 + $0x18] sm:$0xff] }
  0x1b   :  { %v818_v61 = vld [vmem:[%s1498_s6 + $0x8] sm:$0xff]  ;;  %v845_v4 = vld [vmem:[%s1499_s7] sm:$0xff]  ;;  %v847_v9 = vld [vmem:[%s1499_s7 + $0x10] sm:$0xff] }
  0x1c   :  { %292 = vrot.lane.b32.xlu1 %v1063_v20, %s1094_s16  ;;  %290 = vrot.lane.b32.xlu0 %v1198_v21, %s1094_s16  ;;  %v846_v7 = vld [vmem:[%s1499_s7 + $0x8] sm:$0xff]  ;;  %v848_v12 = vld [vmem:[%s1499_s7 + $0x18] sm:$0xff] }
  0x20   :  { %242 = vrot.lane.b32.xlu1 %v1063_v20, %s1093_s15  ;;  %240 = vrot.lane.b32.xlu0 %v1198_v21, %s1093_s15 }
  0x24   :  { %288 = vrot.lane.b32.xlu1 %v1065_v22, %s1094_s16  ;;  %286 = vrot.lane.b32.xlu0 %v1202_v23, %s1094_s16 }
  0x28   :  { %238 = vrot.lane.b32.xlu1 %v1065_v22, %s1093_s15  ;;  %236 = vrot.lane.b32.xlu0 %v1202_v23, %s1093_s15 }
  0x2c   :  { %275 = vrot.lane.b32.xlu1 %v1060_v17, %s1095_s0  ;;  %273 = vrot.lane.b32.xlu0 %v1190_v16, %s1095_s0 }
  0x30   :  { %271 = vrot.lane.b32.xlu1 %v1061_v18, %s1095_s0  ;;  %269 = vrot.lane.b32.xlu0 %v1194_v19, %s1095_s0 }
  0x34   :  { %267 = vrot.lane.b32.xlu1 %v1063_v20, %s1095_s0  ;;  %265 = vrot.lane.b32.xlu0 %v1198_v21, %s1095_s0 }
  0x38   :  { %263 = vrot.lane.b32.xlu1 %v1065_v22, %s1095_s0  ;;  %261 = vrot.lane.b32.xlu0 %v1202_v23, %s1095_s0 }
  0x3c   :  { %597 = vperm.xlu1 %1058, %v519_v26   ;;  %592 = vperm.xlu0 %1057, %v518_v28  }
  0x40   :  { %704 = vperm.xlu1 %1058, %v630_v27   ;;  %709 = vperm.xlu0 %1057, %v631_v30  }
  0x44   :  { %582 = vperm.xlu1 %1058, %v516_v29   ;;  %587 = vperm.xlu0 %1057, %v517_v32  }
  0x48   :  { %694 = vperm.xlu1 %1058, %v628_v31   ;;  %699 = vperm.xlu0 %1057, %v629_v34  }
  0x4c   :  { %572 = vperm.xlu1 %1058, %v514_v33   ;;  %577 = vperm.xlu0 %1057, %v515_v36  }
  0x50   :  { %684 = vperm.xlu1 %1058, %v626_v35   ;;  %689 = vperm.xlu0 %1057, %v627_v38  }
  0x54   :  { %562 = vperm.xlu1 %1058, %v512_v37   ;;  %567 = vperm.xlu0 %1057, %v513_v40  }
  0x58   :  { %674 = vperm.xlu1 %1058, %v624_v39   ;;  %679 = vperm.xlu0 %1057, %v625_v42   ;;  %v1073_v42 = vld [vmem:[%s1494_s2 + $0x24] ss:$8 sps:$4 sm:$0xff]  }
  0x5c   :  { %552 = vperm.xlu1 %1058, %v510_v41   ;;  %557 = vperm.xlu0 %1057, %v511_v44   ;;  %v1078_v44 = vld [vmem:[%s1494_s2 + $0x30] ss:$8 sps:$4 sm:$0xff]  }
  0x60   :  { %664 = vperm.xlu1 %1058, %v622_v43   ;;  %669 = vperm.xlu0 %1057, %v623_v46   ;;  %v1076_v43 = vld [vmem:[%s1494_s2 + $0x34] ss:$8 sps:$4 sm:$0xff]   ;;  %v1081_v46 = vld [vmem:[%s1494_s2 + $0x40] ss:$8 sps:$4 sm:$0xff]  }
  0x64   :  { %542 = vperm.xlu1 %1058, %v508_v45   ;;  %547 = vperm.xlu0 %1057, %v509_v48   ;;  %v1079_v45 = vld [vmem:[%s1494_s2 + $0x44] ss:$8 sps:$4 sm:$0xff]   ;;  %v1084_v48 = vld [vmem:[%s1494_s2 + $0x50] ss:$8 sps:$4 sm:$0xff]  }
  0x68   :  { %654 = vperm.xlu1 %1058, %v620_v47   ;;  %659 = vperm.xlu0 %1057, %v621_v50   ;;  %v1082_v47 = vld [vmem:[%s1494_s2 + $0x54] ss:$8 sps:$4 sm:$0xff]   ;;  %v1087_v50 = vld [vmem:[%s1494_s2 + $0x60] ss:$8 sps:$4 sm:$0xff]  }
  0x6c   :  { %532 = vperm.xlu1 %1058, %v506_v49   ;;  %537 = vperm.xlu0 %1057, %v507_v52   ;;  %v1085_v49 = vld [vmem:[%s1494_s2 + $0x64] ss:$8 sps:$4 sm:$0xff]   ;;  %v1090_v52 = vld [vmem:[%s1494_s2 + $0x70] ss:$8 sps:$4 sm:$0xff]  }
  0x70   :  { %644 = vperm.xlu1 %1058, %v618_v51   ;;  %649 = vperm.xlu0 %1057, %v619_v54   ;;  %v1088_v51 = vld [vmem:[%s1494_s2 + $0x74] ss:$8 sps:$4 sm:$0xff]  }
  0x74   :  { %522 = vperm.xlu1 %1058, %v504_v53   ;;  %527 = vperm.xlu0 %1057, %v505_v56  }
  0x78   :  { %634 = vperm.xlu1 %1058, %v616_v55   ;;  %639 = vperm.xlu0 %1057, %v617_v57  }
  0x7c   :  { %823 = vperm.xlu1 %1058, %v817_v58   ;;  %828 = vperm.xlu0 %1057, %v818_v61  }
  0x7e   :  { %v249_v59 = vpop.permute.xlu1 %248  ;;  %v299_v60 = vpop.permute.xlu0 %298 }
  0x80   :  { %833 = vperm.xlu1 %1058, %v819_v62   ;;  %838 = vperm.xlu0 %1057, %v820_v1  }
  0x82   :  { %v251_v63 = vpop.permute.xlu1 %250  ;;  %v301_v0 = vpop.permute.xlu0 %300 }
  0x83   :  { %v306_v2 = vsel %vm302_vm0, %v299_v60, %v301_v0  ;;  %v256_v3 = vsel %vm252_vm1, %v249_v59, %v251_v63 }
  0x84   :  { %959 = vmatprep.subr.bf16.mxu0 %v306_v2  ;;  %851 = vperm.xlu1 %1058, %v845_v4  }
  0x85   :  { %960 = vmatpush3.bf16.msra.mxu0 %v256_v3  ;;  %856 = vperm.xlu0 %1057, %v846_v7  }
  0x86   :  { %v297_v5 = vpop.permute.xlu1 %296  ;;  %v295_v6 = vpop.permute.xlu0 %294 }
  0x87   :  { %v305_v8 = vsel %vm302_vm0, %v295_v6, %v297_v5 }
  0x88   :  { %961 = vmatprep.subr.bf16.mxu0 %v305_v8  ;;  %861 = vperm.xlu1 %1058, %v847_v9   ;;  %v1091_v9 = vld [vmem:[%s1497_s5] sm:$0xff]  }
  0x89   :  { %866 = vperm.xlu0 %1057, %v848_v12   ;;  %1049 = vmatprep.mubr.bf16.mxu1 %v1091_v9 }
  0x8a   :  { %v247_v10 = vpop.permute.xlu1 %246  ;;  %v245_v11 = vpop.permute.xlu0 %244 }
  0x8b   :  { %v255_v13 = vsel %vm252_vm1, %v245_v11, %v247_v10 }
  0x8c   :  { %962 = vmatpush3.bf16.msra.mxu0 %v255_v13 }
  0x8e   :  { %v293_v14 = vpop.permute.xlu1 %292  ;;  %v291_v15 = vpop.permute.xlu0 %290 }
  0x8f   :  { %v304_v17 = vsel %vm302_vm0, %v291_v15, %v293_v14 }
  0x90   :  { %963 = vmatprep.subr.bf16.mxu0 %v304_v17 }
  0x92   :  { %v243_v18 = vpop.permute.xlu1 %242  ;;  %v241_v20 = vpop.permute.xlu0 %240 }
  0x93   :  { %v254_v22 = vsel %vm252_vm1, %v241_v20, %v243_v18 }
  0x94   :  { %964 = vmatpush3.bf16.msra.mxu0 %v254_v22 }
  0x96   :  { %v289_v24 = vpop.permute.xlu1 %288  ;;  %v287_v25 = vpop.permute.xlu0 %286 }
  0x97   :  { %v303_v26 = vsel %vm302_vm0, %v287_v25, %v289_v24 }
  0x98   :  { %965 = vmatprep.subr.bf16.mxu0 %v303_v26 }
  0x9a   :  { %v239_v27 = vpop.permute.xlu1 %238  ;;  %v237_v28 = vpop.permute.xlu0 %236 }
  0x9b   :  { %v253_v29 = vsel %vm252_vm1, %v237_v28, %v239_v27 }
  0x9c   :  { %966 = vmatpush3.bf16.msra.mxu0 %v253_v29 }
  0x9e   :  { %v276_v30 = vpop.permute.xlu1 %275  ;;  %v274_v31 = vpop.permute.xlu0 %273 }
  0x9f   :  { %v281_v32 = vsel %vm277_vm2, %v274_v31, %v276_v30 }
  0xa0   :  { %967 = vmatprep.subr.bf16.mxu0 %v281_v32 }
  0xa1   :  { %968 = vmatpush3.bf16.msra.mxu0 %v1190_v16  ;;  %v1067_v16 = vld [vmem:[%s1494_s2] ss:$8 sps:$4 sm:$0xff]  }
  0xa2   :  { %v272_v33 = vpop.permute.xlu1 %271  ;;  %v270_v34 = vpop.permute.xlu0 %269 }
  0xa3   :  { %v280_v35 = vsel %vm277_vm2, %v270_v34, %v272_v33 }
  0xa4   :  { %969 = vmatprep.subr.bf16.mxu0 %v280_v35 }
  0xa5   :  { %970 = vmatpush3.bf16.msra.mxu0 %v1194_v19  ;;  %v1070_v19 = vld [vmem:[%s1494_s2 + $0x14] ss:$8 sps:$4 sm:$0xff]  }
  0xa6   :  { %v268_v36 = vpop.permute.xlu1 %267  ;;  %v266_v37 = vpop.permute.xlu0 %265 }
  0xa7   :  { %v279_v38 = vsel %vm277_vm2, %v266_v37, %v268_v36 }
  0xa8   :  { %971 = vmatprep.subr.bf16.mxu0 %v279_v38 }
  0xa9   :  { %972 = vmatpush3.bf16.msra.mxu0 %v1198_v21  ;;  %v1072_v21 = vld [vmem:[%s1494_s2 + $0x10] ss:$8 sps:$4 sm:$0xff]  }
  0xaa   :  { %v264_v39 = vpop.permute.xlu1 %263  ;;  %v262_v40 = vpop.permute.xlu0 %261 }
  0xab   :  { %v278_v41 = vsel %vm277_vm2, %v262_v40, %v264_v39 }
  0xac   :  { %973 = vmatprep.subr.bf16.mxu0 %v278_v41 }
  0xad   :  { %974 = vmatpush3.bf16.msra.mxu0 %v1202_v23  ;;  %v1075_v23 = vld [vmem:[%s1494_s2 + $0x20] ss:$8 sps:$4 sm:$0xff]  }
  0xb0   :  { %440 = vmatmul.mubr.bf16.vlgmr.msra.gmra.mxu0 %v1067_v16 }
  0xb1   :  { %447 = vmatprep.mubr.bf16.mxu0 %v1070_v19 }
  0xb7   :  { %v1394_v53 = vpop.permute.xlu1 %597  ;;  %v1396_v54 = vpop.permute.xlu0 %592 }
  0xb8   :  { %448 = vmatmul.mubr.bf16.gmra.mxu0 %v1072_v21 }
  0xb9   :  { %455 = vmatprep.mubr.bf16.mxu0 %v1073_v42 }
  0xbb   :  { %v1398_v55 = vpop.permute.xlu1 %704  ;;  %v1400_v56 = vpop.permute.xlu0 %709 }
  0xbf   :  { %v1402_v57 = vpop.permute.xlu1 %582  ;;  %v1404_v58 = vpop.permute.xlu0 %587 }
  0xc0   :  { %456 = vmatmul.mubr.bf16.gmra.mxu0 %v1075_v23 }
  0xc1   :  { %463 = vmatprep.mubr.bf16.mxu0 %v1076_v43 }
  0xc3   :  { %v1406_v59 = vpop.permute.xlu1 %694  ;;  %v1408_v60 = vpop.permute.xlu0 %699 }
  0xc7   :  { %v1410_v61 = vpop.permute.xlu1 %572  ;;  %v1412_v62 = vpop.permute.xlu0 %577 }
  0xc8   :  { %464 = vmatmul.mubr.bf16.gmra.mxu0 %v1078_v44 }
  0xc9   :  { %471 = vmatprep.mubr.bf16.mxu0 %v1079_v45 }
  0xcb   :  { %v1414_v63 = vpop.permute.xlu1 %684  ;;  %v1416_v0 = vpop.permute.xlu0 %689 }
  0xcf   :  { %v1418_v1 = vpop.permute.xlu1 %562  ;;  %v1420_v2 = vpop.permute.xlu0 %567 }
  0xd0   :  { %472 = vmatmul.mubr.bf16.gmra.mxu0 %v1081_v46 }
  0xd1   :  { %479 = vmatprep.mubr.bf16.mxu0 %v1082_v47 }
  0xd3   :  { %v1422_v3 = vpop.permute.xlu1 %674  ;;  %v1424_v4 = vpop.permute.xlu0 %679 }
  0xd7   :  { %v1426_v5 = vpop.permute.xlu1 %552  ;;  %v1428_v6 = vpop.permute.xlu0 %557 }
  0xd8   :  { %480 = vmatmul.mubr.bf16.gmra.mxu0 %v1084_v48 }
  0xd9   :  { %487 = vmatprep.mubr.bf16.mxu0 %v1085_v49 }
  0xdb   :  { %v1430_v7 = vpop.permute.xlu1 %664  ;;  %v1432_v8 = vpop.permute.xlu0 %669 }
  0xdf   :  { %v1437_v10 = vpop.permute.xlu1 %542  ;;  %v1439_v11 = vpop.permute.xlu0 %547 }
  0xe0   :  { %488 = vmatmul.mubr.bf16.gmra.mxu0 %v1087_v50 }
  0xe1   :  { %495 = vmatprep.mubr.bf16.mxu0 %v1088_v51 }
  0xe3   :  { %v1441_v12 = vpop.permute.xlu1 %654  ;;  %v1443_v13 = vpop.permute.xlu0 %659 }
  0xe7   :  { %v533_v14 = vpop.permute.xlu1 %532  ;;  %v538_v15 = vpop.permute.xlu0 %537 }
  0xe8   :  { %496 = vmatmul.mubr.bf16.gmra.mxu0 %v1090_v52 }
  0xeb   :  { %v645_v17 = vpop.permute.xlu1 %644  ;;  %v650_v18 = vpop.permute.xlu0 %649 }
  0xef   :  { %v523_v22 = vpop.permute.xlu1 %522  ;;  %v528_v25 = vpop.permute.xlu0 %527 }
  0xf3   :  { %v635_v29 = vpop.permute.xlu1 %634  ;;  %v640_v33 = vpop.permute.xlu0 %639 }
 0x170   :  { %v975_v20 = vpop.f32.mrf.mxu0 }
 0x172   :  { %v976_v24 = vpop.f32.mrf.mxu0 }
 0x173   :  { %v977_v26 = vadd.f32 %v976_v24, %v975_v20 }
 0x174   :  { %v978_v27 = vpop.f32.mrf.mxu0 }
 0x175   :  { %v600_v28 = vmul.f32 %v977_v26, %v523_v22 }
 0x176   :  { %v979_v30 = vpop.f32.mrf.mxu0 }
 0x177   :  { %v980_v31 = vadd.f32 %v979_v30, %v978_v27  ;;  %v712_v34 = vadd.f32 %v635_v29, %v600_v28 }
 0x178   :  { %v981_v32 = vpop.f32.mrf.mxu0 }
 0x179   :  { %v601_v35 = vmul.f32 %v980_v31, %v528_v25  ;;  %v728_v40 = vmax.f32 %v712_v34, 0.0 }
 0x17a   :  { %v982_v36 = vpop.f32.mrf.mxu0 }
 0x17b   :  { %v983_v37 = vadd.f32 %v982_v36, %v981_v32  ;;  %v713_v38 = vadd.f32 %v640_v33, %v601_v35 }
 0x17c   :  { %v984_v39 = vpop.f32.mrf.mxu0 }
 0x17d   :  { %v602_v41 = vmul.f32 %v983_v37, %v533_v14  ;;  %v729_v16 = vmax.f32 %v713_v38, 0.0 }
 0x17e   :  { %v985_v19 = vpop.f32.mrf.mxu0 }
 0x17f   :  { %v1445_v21 = vpack.c.bf16 %v729_v16, %v728_v40  ;;  %v986_v42 = vadd.f32 %v985_v19, %v984_v39  ;;  %v714_v43 = vadd.f32 %v645_v17, %v602_v41 }
 0x180   :  { %v1447_v23 = vpop.f32.mrf.mxu0 }
 0x181   :  { %v603_v44 = vmul.f32 %v986_v42, %v538_v15  ;;  %v730_v48 = vmax.f32 %v714_v43, 0.0 }
 0x182   :  { %v1449_v45 = vpop.f32.mrf.mxu0 }
 0x183   :  { %v715_v46 = vadd.f32 %v650_v18, %v603_v44 }
 0x184   :  { %v990_v47 = vpop.f32.mrf.mxu0 }
 0x185   :  { %v731_v49 = vmax.f32 %v715_v46, 0.0 }
 0x186   :  { %v991_v50 = vpop.f32.mrf.mxu0 }
 0x187   :  { %v1451_v51 = vpack.c.bf16 %v731_v49, %v730_v48 }
 0x188   :  { %v993_v52 = vpop.f32.mrf.mxu0 }
 0x18a   :  { %v994_v9 = vpop.f32.mrf.mxu0 }
 0x18c   :  { %v996_v14 = vpop.f32.mrf.mxu0 }
 0x18e   :  { %v997_v20 = vpop.f32.mrf.mxu0 }
 0x190   :  { %v999_v22 = vpop.f32.mrf.mxu0 }
 0x192   :  { %v1000_v24 = vpop.f32.mrf.mxu0 }
 0x194   :  { %v1002_v25 = vpop.f32.mrf.mxu0 }
 0x196   :  { %v1003_v26 = vpop.f32.mrf.mxu0 }
 0x197   :  { %v1004_v43 = vadd.f32 %v1003_v26, %v1002_v25 }
 0x198   :  { %v1005_v27 = vpop.f32.mrf.mxu0 }
 0x19a   :  { %v1006_v17 = vpop.f32.mrf.mxu0 }
 0x19b   :  { %v1007_v16 = vadd.f32 %v1006_v17, %v1005_v27  ;;  %v998_v27 = vadd.f32 %v997_v20, %v996_v14 }
 0x19c   :  { %v1008_v15 = vpop.f32.mrf.mxu0 }
 0x19e   :  { %v1009_v28 = vpop.f32.mrf.mxu0 }
 0x19f   :  { %v1010_v38 = vadd.f32 %v1009_v28, %v1008_v15  ;;  %v610_v15 = vmul.f32 %v1007_v16, %v1410_v61  ;;  %v992_v61 = vadd.f32 %v991_v50, %v990_v47 }
 0x1a0   :  { %v1011_v29 = vpop.f32.mrf.mxu0 }
 0x1a1   :  { %v611_v44 = vmul.f32 %v1010_v38, %v1412_v62 }
 0x1a2   :  { %v1012_v18 = vpop.f32.mrf.mxu0 }
 0x1a3   :  { %v1013_v35 = vadd.f32 %v1012_v18, %v1011_v29  ;;  %v1001_v29 = vadd.f32 %v1000_v24, %v999_v22  ;;  %v723_v25 = vadd.f32 %v1416_v0, %v611_v44  ;;  %v989_v0 = vadd.f32 %v1449_v45, %v1447_v23 }
 0x1a4   :  { %v1014_v30 = vpop.f32.mrf.mxu0 }
 0x1a5   :  { %v612_v19 = vmul.f32 %v1013_v35, %v1402_v57  ;;  %v609_v57 = vmul.f32 %v1004_v43, %v1420_v2  ;;  %v739_v14 = vmax.f32 %v723_v25, 0.0 }
 0x1a6   :  { %v1015_v31 = vpop.f32.mrf.mxu0 }
 0x1a7   :  { %v1016_v33 = vadd.f32 %v1015_v31, %v1014_v30 }
 0x1a8   :  { %v1017_v32 = vpop.f32.mrf.mxu0 }
 0x1a9   :  { %v613_v39 = vmul.f32 %v1016_v33, %v1404_v58  ;;  %v724_v58 = vadd.f32 %v1406_v59, %v612_v19  ;;  %v607_v59 = vmul.f32 %v998_v27, %v1428_v6 }
 0x1aa   :  { %v1018_v34 = vpop.f32.mrf.mxu0 }
 0x1ab   :  { %v1019_v36 = vadd.f32 %v1018_v34, %v1017_v32  ;;  %v725_v46 = vadd.f32 %v1408_v60, %v613_v39  ;;  %v995_v60 = vadd.f32 %v994_v9, %v993_v52  ;;  %v740_v22 = vmax.f32 %v724_v58, 0.0 }
 0x1ac   :  { %v1020_v37 = vpop.f32.mrf.mxu0  ;;  %v719_v47 = vadd.f32 %v1432_v8, %v607_v59 }
 0x1ad   :  { %v614_v40 = vmul.f32 %v1019_v36, %v1396_v54  ;;  %v741_v26 = vmax.f32 %v725_v46, 0.0  ;;  %v606_v52 = vmul.f32 %v995_v60, %v1426_v5 }
 0x1ae   :  { %v1021_v41 = vpop.f32.mrf.mxu0  ;;  %v735_v5 = vmax.f32 %v719_v47, 0.0 }
 0x1af   :  { %v1022_v42 = vadd.f32 %v1021_v41, %v1020_v37  ;;  %v726_v49 = vadd.f32 %v1398_v55, %v614_v40  ;;  %v722_v55 = vadd.f32 %v1414_v63, %v610_v15  ;;  %v750_v2 = vpack.c.bf16 %v741_v26, %v740_v22 }
 0x1b0   :  { %v605_v63 = vmul.f32 %v992_v61, %v1439_v11  ;;  %v718_v20 = vadd.f32 %v1430_v7, %v606_v52  ;;  %v1092_v7 = vld [vmem:[%s1497_s5 + $0x8] sm:$0xff]  }
 0x1b1   :  { %v615_v48 = vmul.f32 %v1022_v42, %v1394_v53  ;;  %v742_v62 = vmax.f32 %v726_v49, 0.0  ;;  %v608_v53 = vmul.f32 %v1001_v29, %v1418_v1  ;;  %v738_v9 = vmax.f32 %v722_v55, 0.0 }
 0x1b2   :  { %v717_v23 = vadd.f32 %v1443_v13, %v605_v63  ;;  %v734_v18 = vmax.f32 %v718_v20, 0.0 }
 0x1b3   :  { %v727_v54 = vadd.f32 %v1400_v56, %v615_v48  ;;  %v721_v56 = vadd.f32 %v1424_v4, %v609_v57  ;;  %v720_v1 = vadd.f32 %v1422_v3, %v608_v53  ;;  %v749_v50 = vpack.c.bf16 %v739_v14, %v738_v9 }
 0x1b4   :  { %v604_v4 = vmul.f32 %v989_v0, %v1437_v10  ;;  %v733_v11 = vmax.f32 %v717_v23, 0.0  ;;  %v747_v8 = vpack.c.bf16 %v735_v5, %v734_v18  ;;  %v824_v10 = vpop.permute.xlu1 %823 }
 0x1b5   :  { %v743_v17 = vmax.f32 %v727_v54, 0.0  ;;  %v737_v6 = vmax.f32 %v721_v56, 0.0  ;;  %v736_v28 = vmax.f32 %v720_v1, 0.0 }
 0x1b6   :  { %v716_v3 = vadd.f32 %v1441_v12, %v604_v4  ;;  %v829_v12 = vpop.permute.xlu0 %828 }
 0x1b7   :  { %v751_v24 = vpack.c.bf16 %v743_v17, %v742_v62  ;;  %v748_v45 = vpack.c.bf16 %v737_v6, %v736_v28 }
 0x1b8   :  { %v732_v30 = vmax.f32 %v716_v3, 0.0  ;;  %v834_v13 = vpop.permute.xlu1 %833 }
 0x1b9   :  { %1033 = vmatprep.subr.bf16.mxu1 %v751_v24 }
 0x1ba   :  { %1034 = vmatpush3.bf16.msra.mxu1 %v751_v24  ;;  %v746_v31 = vpack.c.bf16 %v733_v11, %v732_v30  ;;  %v839_v32 = vpop.permute.xlu0 %838 }
 0x1bb   :  { %1035 = vmatprep.subr.bf16.mxu1 %v750_v2 }
 0x1bc   :  { %v852_v33 = vpop.permute.xlu1 %851 }
 0x1be   :  { %1036 = vmatpush3.bf16.msra.mxu1 %v750_v2  ;;  %v857_v34 = vpop.permute.xlu0 %856 }
 0x1bf   :  { %1037 = vmatprep.subr.bf16.mxu1 %v749_v50 }
 0x1c2   :  { %1038 = vmatpush3.bf16.msra.mxu1 %v749_v50  ;;  %v867_v41 = vpop.permute.xlu0 %866 }
 0x1c3   :  { %1039 = vmatprep.subr.bf16.mxu1 %v748_v45 }
 0x1c6   :  { %1040 = vmatpush3.bf16.msra.mxu1 %v748_v45 }
 0x1c7   :  { %1041 = vmatprep.subr.bf16.mxu1 %v747_v8 }
 0x1ca   :  { %1042 = vmatpush3.bf16.msra.mxu1 %v747_v8 }
 0x1cb   :  { %1043 = vmatprep.subr.bf16.mxu1 %v746_v31 }
 0x1ce   :  { %1044 = vmatpush3.bf16.msra.mxu1 %v746_v31 }
 0x1cf   :  { %1045 = vmatprep.subr.bf16.mxu1 %v1451_v51 }
 0x1d2   :  { %1046 = vmatpush3.bf16.msra.mxu1 %v1451_v51  ;;  %v862_v51 = vpop.permute.xlu1 %861 }
 0x1d3   :  { %1047 = vmatprep.subr.bf16.mxu1 %v1445_v21 }
 0x1d6   :  { %1048 = vmatpush3.bf16.msra.mxu1 %v1445_v21 }
 0x1d9   :  { %1050 = vmatmul.mubr.bf16.vlgmr.msra.gmra.mxu1 %v1092_v7 }
 0x299   :  { %v1051_v35 = vpop.f32.mrf.mxu1 }
 0x29a   :  { %v843_v37 = vmul.f32 %v1051_v35, %v834_v13 }
 0x29b   :  { %v802_v36 = vpop.f32.mrf.mxu1 }
 0x29c   :  { %v841_v39 = vmul.f32 %v824_v10, %v802_v36  ;;  %v871_v19 = vadd.f32 %v862_v51, %v843_v37 }
 0x29d   :  { %v1052_v38 = vpop.f32.mrf.mxu1 }
 0x29e   :  { %v844_v40 = vmul.f32 %v1052_v38, %v839_v32  ;;  %v869_v21 = vadd.f32 %v852_v33, %v841_v39 }
 0x29f   :  { %v805_v16 = vpop.f32.mrf.mxu1 }
 0x2a0   :  { %v872_v42 = vadd.f32 %v867_v41, %v844_v40  ;;  %v842_v43 = vmul.f32 %v829_v12, %v805_v16 }
 0x2a2   :  { %v956_v44 = vpack.c.bf16 %v872_v42, %v871_v19  ;;  %v870_v46 = vadd.f32 %v857_v34, %v842_v43 }
 0x2a4   :  { %958 = vst [vmem:[%s1500_s8 + $0x8] sm:$0xff] %v956_v44   ;;  %v951_v48 = vpack.c.bf16 %v870_v46, %v869_v21 }
 0x2a6   :  { %952 = vst [vmem:[%s1500_s8] sm:$0xff] %v951_v48  }

</bundles_post_ra>
